<compile_context>
chip_gen: v6e
topology: v6e:2x2x1
jax: 0.10.0
libtpu: 0.0.40
codegen_flags: <defaults>
</compile_context>

<pallas_src>
import jax
import jax.numpy as jnp
from jax import lax
from jax.experimental import pallas as pl
from jax.experimental.pallas import tpu as pltpu

BN_EPS = 1e-5       # nn.BatchNorm1d default eps
NORM_EPS = 1e-12    # F.normalize default eps


# ----------------------------------------------------------------------------
# Kernel
# ----------------------------------------------------------------------------
def make_byol_kernel(num_pairs, flip_pairs):
    """num_pairs (NP) = pairings handled by one program (1 or 2).
    flip_pairs=True pairs prediction segment j with target segment NP-1-j
    (used by the fused single-program layout where both branches see the views
    in natural [view1; view2] order)."""
    NP = num_pairs

    def kernel(x_on_ref, x_tg_ref, wb_ref, wbt_ref, wp1_ref, wp1t_ref,
               wp2_ref, wp2t_ref, wq1_ref, wq2_ref, vec_ref, loss_ref):
        P = wb_ref.shape[1]          # backbone output dim (inplanes)
        PH = wp1_ref.shape[1]        # projection hidden dim
        PD = wp2_ref.shape[1]        # projection output dim
        QH = wq1_ref.shape[1]        # predictor hidden dim
        R = x_on_ref.shape[0]        # rows handled by this program (NP * B)
        B = R // NP

        def mxu(h, w_ref):
            # bf16 MXU matmul with f32 accumulation.
            return jnp.dot(h.astype(jnp.bfloat16), w_ref[...],
                           preferred_element_type=jnp.float32)

        def batchnorm1d(y, gamma, beta):
            # Training-mode BatchNorm1d with statistics computed over each
            # view's B rows (matches the reference's per-view forward calls).
            # TODO(synk): running-mean/var buffers not updated (loss-only fwd).
            if NP == 1:
                mean = jnp.mean(y, axis=0, keepdims=True)
                cen = y - mean
                var = jnp.mean(cen * cen, axis=0, keepdims=True)
                out = cen * lax.rsqrt(var + BN_EPS)
            else:
                f = y.shape[-1]
                y3 = y.reshape(NP, B, f)
                mean = jnp.mean(y3, axis=1, keepdims=True)
                cen = y3 - mean
                var = jnp.mean(cen * cen, axis=1, keepdims=True)
                out = (cen * lax.rsqrt(var + BN_EPS)).reshape(R, f)
            return out * gamma + beta

        relu = lambda v: jnp.maximum(v, 0.0)

        # Packed small vectors (one per row). Biases of Linears that feed a
        # BatchNorm1d (bp1, bp1t, bq1) are omitted: batch-mean cancels them.
        bb     = vec_ref[0:1, :P]
        bbt    = vec_ref[1:2, :P]
        gp     = vec_ref[2:3, :PH]
        gpt    = vec_ref[3:4, :PH]
        betap  = vec_ref[4:5, :PH]
        betapt = vec_ref[5:6, :PH]
        bp2    = vec_ref[6:7, :PD]
        bp2t   = vec_ref[7:8, :PD]
        gq     = vec_ref[8:9, :QH]
        betaq  = vec_ref[9:10, :QH]
        bq2    = vec_ref[10:11, :PD]

        x_on = x_on_ref[...]         # [R, IN] bf16, online-branch view rows
        x_tg = x_tg_ref[...]         # [R, IN] bf16, paired target view rows

        # Online branch: backbone -> projector -> predictor.
        h = relu(mxu(x_on, wb_ref) + bb)                        # [R, P]
        y = relu(batchnorm1d(mxu(h, wp1_ref), gp, betap))       # [R, PH]
        z = relu(mxu(y, wp2_ref) + bp2)                         # [R, PD]
        u = relu(batchnorm1d(mxu(z, wq1_ref), gq, betaq))       # [R, QH]
        p = relu(mxu(u, wq2_ref) + bq2)                         # [R, PD] predictions

        # Target branch (no_grad in the reference; loss-only forward here).
        # TODO(synk): target-network EMA update (epsilon) is a training-time op.
        ht = relu(mxu(x_tg, wbt_ref) + bbt)                     # [R, P]
        yt = relu(batchnorm1d(mxu(ht, wp1t_ref), gpt, betapt))  # [R, PH]
        t = relu(mxu(yt, wp2t_ref) + bp2t)                      # [R, PD] target proj

        # regression_loss = 2 - 2 * <normalize(p), normalize(t)>, with
        # F.normalize's max(||.||, eps) clamp rewritten via rsqrt on squared
        # norms. Summed in-kernel -> one scalar per program.
        eps2 = NORM_EPS * NORM_EPS
        total = None
        for j in range(NP):
            k = (NP - 1 - j) if flip_pairs else j
            pj = p[j * B:(j + 1) * B]
            tj = t[k * B:(k + 1) * B]
            d  = jnp.sum(pj * tj, axis=-1, keepdims=True)
            pp = jnp.sum(pj * pj, axis=-1, keepdims=True)
            tt = jnp.sum(tj * tj, axis=-1, keepdims=True)
            cos = (d * lax.rsqrt(jnp.maximum(pp, eps2))
                     * lax.rsqrt(jnp.maximum(tt, eps2)))
            s = jnp.sum(2.0 - 2.0 * cos)
            total = s if total is None else total + s

        # Lane-dense scalar store (avoids masked 1-lane partial stores).
        loss_ref[...] = jnp.full(loss_ref.shape, total, jnp.float32)

    return kernel


# ----------------------------------------------------------------------------
# Parameter construction / packing
# ----------------------------------------------------------------------------
def linear_init(key, fan_in, fan_out):
    # PyTorch nn.Linear default init: U(-1/sqrt(fan_in), 1/sqrt(fan_in)).
    k1, k2 = jax.random.split(key)
    bound = 1.0 / float(fan_in) ** 0.5
    w = jax.random.uniform(k1, (fan_in, fan_out), jnp.float32, -bound, bound)
    b = jax.random.uniform(k2, (fan_out,), jnp.float32, -bound, bound)
    return w, b


def make_byol_params(key, in_dim, inplanes, proj_hidden, proj_dim, pred_hidden):
    ks = jax.random.split(key, 5)
    wb, bb = linear_init(ks[0], in_dim, inplanes)          # backbone Linear+ReLU
    wp1, bp1 = linear_init(ks[1], inplanes, proj_hidden)   # proj L1
    gp = jnp.ones((proj_hidden,), jnp.float32)
    betap = jnp.zeros((proj_hidden,), jnp.float32)
    wp2, bp2 = linear_init(ks[2], proj_hidden, proj_dim)   # proj L2
    wq1, bq1 = linear_init(ks[3], proj_dim, pred_hidden)   # pred L1
    gq = jnp.ones((pred_hidden,), jnp.float32)
    betaq = jnp.zeros((pred_hidden,), jnp.float32)
    wq2, bq2 = linear_init(ks[4], pred_hidden, proj_dim)   # pred L2
    params = dict(wb=wb, bb=bb, wp1=wp1, bp1=bp1, gp=gp, betap=betap,
                  wp2=wp2, bp2=bp2, wq1=wq1, bq1=bq1, gq=gq, betaq=betaq,
                  wq2=wq2, bq2=bq2)
    # target network = copy.deepcopy(online network) at init -> identical weights
    params.update(wbt=wb, bbt=bb, wp1t=wp1, bp1t=bp1, gpt=gp, betapt=betap,
                  wp2t=wp2, bp2t=bp2)
    return params


def pack_params(p):
    """Cast the per-branch weight matrices to bf16 (de-padded: no block-diag
    zero halves, no zero-padded predictor rows) and pack the small bias / BN
    vectors into one [16, L] f32 array (one DMA instead of 11).

    Biases of Linears that feed a BatchNorm1d (bp1, bp1t, bq1) are omitted:
    the per-feature batch-mean subtraction cancels them exactly."""
    f32, bf16 = jnp.float32, jnp.bfloat16
    P = p["wb"].shape[1]
    PH = p["wp1"].shape[1]
    PD = p["wp2"].shape[1]
    QH = p["wq1"].shape[1]
    L = max(P, PH, PD, QH)

    def row(v):
        v = v.astype(f32).reshape(-1)
        return jnp.pad(v, (0, L - v.shape[0]))

    rows = [
        row(p["bb"]),      # 0: backbone bias (online)   [P]
        row(p["bbt"]),     # 1: backbone bias (target)   [P]
        row(p["gp"]),      # 2: proj BN gamma (online)   [PH]
        row(p["gpt"]),     # 3: proj BN gamma (target)   [PH]
        row(p["betap"]),   # 4: proj BN beta  (online)   [PH]
        row(p["betapt"]),  # 5: proj BN beta  (target)   [PH]
        row(p["bp2"]),     # 6: proj out bias (online)   [PD]
        row(p["bp2t"]),    # 7: proj out bias (target)   [PD]
        row(p["gq"]),      # 8: pred BN gamma            [QH]
        row(p["betaq"]),   # 9: pred BN beta             [QH]
        row(p["bq2"]),     # 10: pred out bias           [PD]
    ]
    while len(rows) < 16:
        rows.append(jnp.zeros((L,), f32))
    vecs = jnp.stack(rows, axis=0)                       # [16, L] f32

    return (p["wb"].astype(bf16), p["wbt"].astype(bf16),
            p["wp1"].astype(bf16), p["wp1t"].astype(bf16),
            p["wp2"].astype(bf16), p["wp2t"].astype(bf16),
            p["wq1"].astype(bf16), p["wq2"].astype(bf16),
            vecs)


# ----------------------------------------------------------------------------
# Wrapper
# ----------------------------------------------------------------------------
def _tensorcores_per_chip():
    """Best-effort heuristic: v7x has 2 TensorCores per chip, v5e/v6e have 1."""
    try:
        kind = jax.devices()[0].device_kind.lower()
    except Exception:
        return 1
    return 2 if "7" in kind else 1


def build_byol_forward(num_programs=None):
    """num_programs=2: shard the two loss terms across TensorCores (v7x).
    num_programs=1: fuse both terms into one program (best on v5e/v6e)."""
    G = num_programs if num_programs is not None else _tensorcores_per_chip()
    G = 2 if G >= 2 else 1
    NP = 2 // G
    kernel = make_byol_kernel(num_pairs=NP, flip_pairs=(NP == 2))

    @jax.jit
    def byol_forward(view1, view2, kernel_params):
        (wb, wbt, wp1, wp1t, wp2, wp2t, wq1, wq2, vecs) = kernel_params
        B = view1.shape[0]
        IN = wb.shape[0]
        P, PH = wb.shape[1], wp1.shape[1]
        PD, QH = wp2.shape[1], wq1.shape[1]

        # Single stacked bf16 copy of the two flattened views (rows [0:B] =
        # view1, rows [B:2B] = view2). Online/target branches pick their rows
        # via BlockSpec index maps — no wide x_cat duplication.
        x = jnp.concatenate(
            [view1.reshape(B, -1).astype(jnp.bfloat16),
             view2.reshape(B, -1).astype(jnp.bfloat16)], axis=0)   # [2B, IN]

        if G == 2:
            # Program i: online = view_{i}, target = view_{1-i}.
            x_on_spec = pl.BlockSpec((B, IN), lambda i: (i, 0))
            x_tg_spec = pl.BlockSpec((B, IN), lambda i: (1 - i, 0))
        else:
            # Single fused program sees both views; pairing flip is in-kernel.
            x_on_spec = pl.BlockSpec((2 * B, IN), lambda i: (0, 0))
            x_tg_spec = pl.BlockSpec((2 * B, IN), lambda i: (0, 0))

        def w_spec(arr):
            return pl.BlockSpec(arr.shape, lambda i: (0, 0))

        # Advisory cost estimate so XLA can schedule around this tiny call.
        macs = 2 * B * (2 * IN * P + 2 * P * PH + 2 * PH * PD + PD * QH + QH * PD)
        weight_bytes = 2 * (wb.size + wbt.size + wp1.size + wp1t.size
                            + wp2.size + wp2t.size + wq1.size + wq2.size)
        bytes_accessed = int(G * weight_bytes + 2 * x.size * 2
                             + G * vecs.size * 4 + G * 8 * 128 * 4)
        cost = pl.CostEstimate(flops=2 * macs,
                               transcendentals=2 * (2 * PH + QH) + 8 * B,
                               bytes_accessed=bytes_accessed)

        per_program = pl.pallas_call(
            kernel,
            out_shape=jax.ShapeDtypeStruct((G, 8, 128), jnp.float32),
            grid=(G,),
            in_specs=[x_on_spec, x_tg_spec,
                      w_spec(wb), w_spec(wbt),
                      w_spec(wp1), w_spec(wp1t),
                      w_spec(wp2), w_spec(wp2t),
                      w_spec(wq1), w_spec(wq2),
                      w_spec(vecs)],
            out_specs=pl.BlockSpec((1, 8, 128), lambda i: (i, 0, 0)),
            compiler_params=pltpu.CompilerParams(
                dimension_semantics=("parallel",) if G == 2 else ("arbitrary",)),
            cost_estimate=cost,
        )(x, x, wb, wbt, wp1, wp1t, wp2, wp2t, wq1, wq2, vecs)
        # TODO(synk): for realistic IN (e.g. 224x224x3), add a K-tiled grid
        # axis + f32 VMEM accumulator for the backbone matmul (VMEM limits).

        # Reference: (loss_1 + loss_2).mean() over B rows == sum of all 2B
        # per-row terms divided by B.
        return jnp.sum(per_program[:, 0, 0]) / B

    return byol_forward


# ----------------------------------------------------------------------------
# Pure-JAX reference (weights/activations rounded to bf16 to mirror the MXU)
# ----------------------------------------------------------------------------
def byol_reference(view1, view2, p):
    f32, bf16 = jnp.float32, jnp.bfloat16
    r = lambda a: a.astype(bf16).astype(f32)
    relu = lambda v: jnp.maximum(v, 0.0)

    def linear(x, w, b):
        return jnp.dot(r(x), r(w)) + b

    def bn(y, gamma, beta):
        mean = jnp.mean(y, axis=0, keepdims=True)
        cen = y - mean
        var = jnp.mean(cen * cen, axis=0, keepdims=True)
        return cen * lax.rsqrt(var + BN_EPS) * gamma + beta

    def online(x):
        h = relu(linear(x, p["wb"], p["bb"]))
        y = relu(bn(linear(h, p["wp1"], p["bp1"]), p["gp"], p["betap"]))
        return relu(linear(y, p["wp2"], p["bp2"]))

    def target(x):
        h = relu(linear(x, p["wbt"], p["bbt"]))
        y = relu(bn(linear(h, p["wp1t"], p["bp1t"]), p["gpt"], p["betapt"]))
        return relu(linear(y, p["wp2t"], p["bp2t"]))

    def predictor(z):
        u = relu(bn(linear(z, p["wq1"], p["bq1"]), p["gq"], p["betaq"]))
        return relu(linear(u, p["wq2"], p["bq2"]))

    def normalize(v):
        n = jnp.sqrt(jnp.sum(v * v, axis=-1, keepdims=True))
        return v / jnp.maximum(n, NORM_EPS)

    def reg_loss(a, b):
        return 2.0 - 2.0 * jnp.sum(normalize(a) * normalize(b), axis=-1)

    B = view1.shape[0]
    x1 = view1.reshape(B, -1).astype(f32)
    x2 = view2.reshape(B, -1).astype(f32)
    p1 = predictor(online(x1))
    p2 = predictor(online(x2))
    t1 = target(x2)   # targets_to_view_1
    t2 = target(x1)   # targets_to_view_2
    return jnp.mean(reg_loss(p1, t1) + reg_loss(p2, t2))


# ----------------------------------------------------------------------------
if __name__ == "__main__":
    # Images [B, C, H, W]; backbone = Linear(C*H*W -> inplanes) + ReLU.
    B, C, H, W = 8, 4, 16, 16
    IN_DIM = C * H * W          # 1024
    INPLANES = 64
    PROJ_HIDDEN = 128
    PROJ_DIM = 64
    PRED_HIDDEN = 128
    # epsilon (target EMA momentum) only affects _update_target_network_params,
    # a training-time op outside forward().

    key = jax.random.PRNGKey(0)
    k_v1, k_v2, k_p = jax.random.split(key, 3)
    view1 = jax.random.normal(k_v1, (B, C, H, W), jnp.float32)
    view2 = jax.random.normal(k_v2, (B, C, H, W), jnp.float32)

    params = make_byol_params(k_p, IN_DIM, INPLANES, PROJ_HIDDEN, PROJ_DIM,
                              PRED_HIDDEN)
    kernel_params = pack_params(params)

    byol_forward = build_byol_forward()   # grid chosen per chip (1 vs 2 TCs)
    loss = byol_forward(view1, view2, kernel_params)
    jax.block_until_ready(loss)

    ref = byol_reference(view1, view2, params)
    assert abs(float(loss) - float(ref)) < 1e-2 + 2e-2 * abs(float(ref)), (
        float(loss), float(ref))
    print("KERNEL_OK")
</pallas_src>

<mosaic_0001>
module attributes {stable_mosaic.version = 11 : i64} {
  func.func @kernel(%arg0: i32, %arg1: memref<16x1024xbf16, #tpu.memory_space<vmem>>, %arg2: memref<16x1024xbf16, #tpu.memory_space<vmem>>, %arg3: memref<1024x64xbf16, #tpu.memory_space<vmem>>, %arg4: memref<1024x64xbf16, #tpu.memory_space<vmem>>, %arg5: memref<64x128xbf16, #tpu.memory_space<vmem>>, %arg6: memref<64x128xbf16, #tpu.memory_space<vmem>>, %arg7: memref<128x64xbf16, #tpu.memory_space<vmem>>, %arg8: memref<128x64xbf16, #tpu.memory_space<vmem>>, %arg9: memref<64x128xbf16, #tpu.memory_space<vmem>>, %arg10: memref<128x64xbf16, #tpu.memory_space<vmem>>, %arg11: memref<16x128xf32, #tpu.memory_space<vmem>>, %arg12: memref<1x8x128xf32, #tpu.memory_space<vmem>>) attributes {dimension_semantics = [#tpu.dimension_semantics<arbitrary>], iteration_bounds = array<i64: 1>, scalar_prefetch = 0 : i64, scratch_operands = 0 : i64, tpu.core_type = #tpu.core_type<tc>, window_params = [{pipeline_mode = #tpu.pipeline_mode<synchronous>, transform_indices = @transform_0, window_bounds = array<i64: 16, 1024>}, {pipeline_mode = #tpu.pipeline_mode<synchronous>, transform_indices = @transform_1, window_bounds = array<i64: 16, 1024>}, {pipeline_mode = #tpu.pipeline_mode<synchronous>, transform_indices = @transform_2, window_bounds = array<i64: 1024, 64>}, {pipeline_mode = #tpu.pipeline_mode<synchronous>, transform_indices = @transform_3, window_bounds = array<i64: 1024, 64>}, {pipeline_mode = #tpu.pipeline_mode<synchronous>, transform_indices = @transform_4, window_bounds = array<i64: 64, 128>}, {pipeline_mode = #tpu.pipeline_mode<synchronous>, transform_indices = @transform_5, window_bounds = array<i64: 64, 128>}, {pipeline_mode = #tpu.pipeline_mode<synchronous>, transform_indices = @transform_6, window_bounds = array<i64: 128, 64>}, {pipeline_mode = #tpu.pipeline_mode<synchronous>, transform_indices = @transform_7, window_bounds = array<i64: 128, 64>}, {pipeline_mode = #tpu.pipeline_mode<synchronous>, transform_indices = @transform_8, window_bounds = array<i64: 64, 128>}, {pipeline_mode = #tpu.pipeline_mode<synchronous>, transform_indices = @transform_9, window_bounds = array<i64: 128, 64>}, {pipeline_mode = #tpu.pipeline_mode<synchronous>, transform_indices = @transform_10, window_bounds = array<i64: 16, 128>}, {transform_indices = @transform_11, window_bounds = array<i64: 1, 8, 128>}]} {
    %c0 = arith.constant 0 : index
    %c0_0 = arith.constant 0 : index
    %0 = vector.load %arg11[%c0, %c0_0] : memref<16x128xf32, #tpu.memory_space<vmem>>, vector<1x64xf32>
    %c1 = arith.constant 1 : index
    %c0_1 = arith.constant 0 : index
    %1 = vector.load %arg11[%c1, %c0_1] : memref<16x128xf32, #tpu.memory_space<vmem>>, vector<1x64xf32>
    %c2 = arith.constant 2 : index
    %c0_2 = arith.constant 0 : index
    %2 = vector.load %arg11[%c2, %c0_2] : memref<16x128xf32, #tpu.memory_space<vmem>>, vector<1x128xf32>
    %c3 = arith.constant 3 : index
    %c0_3 = arith.constant 0 : index
    %3 = vector.load %arg11[%c3, %c0_3] : memref<16x128xf32, #tpu.memory_space<vmem>>, vector<1x128xf32>
    %c4 = arith.constant 4 : index
    %c0_4 = arith.constant 0 : index
    %4 = vector.load %arg11[%c4, %c0_4] : memref<16x128xf32, #tpu.memory_space<vmem>>, vector<1x128xf32>
    %c5 = arith.constant 5 : index
    %c0_5 = arith.constant 0 : index
    %5 = vector.load %arg11[%c5, %c0_5] : memref<16x128xf32, #tpu.memory_space<vmem>>, vector<1x128xf32>
    %c6 = arith.constant 6 : index
    %c0_6 = arith.constant 0 : index
    %6 = vector.load %arg11[%c6, %c0_6] : memref<16x128xf32, #tpu.memory_space<vmem>>, vector<1x64xf32>
    %c7 = arith.constant 7 : index
    %c0_7 = arith.constant 0 : index
    %7 = vector.load %arg11[%c7, %c0_7] : memref<16x128xf32, #tpu.memory_space<vmem>>, vector<1x64xf32>
    %c8 = arith.constant 8 : index
    %c0_8 = arith.constant 0 : index
    %8 = vector.load %arg11[%c8, %c0_8] : memref<16x128xf32, #tpu.memory_space<vmem>>, vector<1x128xf32>
    %c9 = arith.constant 9 : index
    %c0_9 = arith.constant 0 : index
    %9 = vector.load %arg11[%c9, %c0_9] : memref<16x128xf32, #tpu.memory_space<vmem>>, vector<1x128xf32>
    %c10 = arith.constant 10 : index
    %c0_10 = arith.constant 0 : index
    %10 = vector.load %arg11[%c10, %c0_10] : memref<16x128xf32, #tpu.memory_space<vmem>>, vector<1x64xf32>
    %c0_11 = arith.constant 0 : index
    %c0_12 = arith.constant 0 : index
    %11 = vector.load %arg1[%c0_11, %c0_12] : memref<16x1024xbf16, #tpu.memory_space<vmem>>, vector<16x1024xbf16>
    %c0_13 = arith.constant 0 : index
    %c0_14 = arith.constant 0 : index
    %12 = vector.load %arg2[%c0_13, %c0_14] : memref<16x1024xbf16, #tpu.memory_space<vmem>>, vector<16x1024xbf16>
    %c0_15 = arith.constant 0 : index
    %c0_16 = arith.constant 0 : index
    %13 = vector.load %arg3[%c0_15, %c0_16] : memref<1024x64xbf16, #tpu.memory_space<vmem>>, vector<1024x64xbf16>
    %cst = arith.constant dense<0.000000e+00> : vector<16x64xf32>
    %14 = tpu.matmul %11, %13, %cst {dimension_numbers = #tpu.dot_dimension_numbers<[1], [0], [0], [1], [0, 0, 1, 1], [], []>} : vector<16x1024xbf16>, vector<1024x64xbf16>, vector<16x64xf32> -> vector<16x64xf32>
    %15 = vector.broadcast %0 : vector<1x64xf32> to vector<16x64xf32>
    %16 = arith.addf %14, %15 : vector<16x64xf32>
    %cst_17 = arith.constant 0.000000e+00 : f32
    %17 = vector.broadcast %cst_17 : f32 to vector<16x64xf32>
    %18 = arith.maximumf %16, %17 : vector<16x64xf32>
    %19 = arith.truncf %18 : vector<16x64xf32> to vector<16x64xbf16>
    %c0_18 = arith.constant 0 : index
    %c0_19 = arith.constant 0 : index
    %20 = vector.load %arg5[%c0_18, %c0_19] : memref<64x128xbf16, #tpu.memory_space<vmem>>, vector<64x128xbf16>
    %cst_20 = arith.constant dense<0.000000e+00> : vector<16x128xf32>
    %21 = tpu.matmul %19, %20, %cst_20 {dimension_numbers = #tpu.dot_dimension_numbers<[1], [0], [0], [1], [0, 0, 1, 1], [], []>} : vector<16x64xbf16>, vector<64x128xbf16>, vector<16x128xf32> -> vector<16x128xf32>
    %22 = vector.shape_cast %21 : vector<16x128xf32> to vector<2x8x128xf32>
    %cst_21 = arith.constant dense<0.000000e+00> : vector<2x128xf32>
    %23 = vector.multi_reduction <add>, %22, %cst_21 [1] : vector<2x8x128xf32> to vector<2x128xf32>
    %24 = vector.shape_cast %23 : vector<2x128xf32> to vector<2x1x128xf32>
    %cst_22 = arith.constant 8.000000e+00 : f32
    %25 = vector.broadcast %cst_22 : f32 to vector<2x1x128xf32>
    %26 = arith.divf %24, %25 : vector<2x1x128xf32>
    %27 = vector.broadcast %26 : vector<2x1x128xf32> to vector<2x8x128xf32>
    %28 = arith.subf %22, %27 : vector<2x8x128xf32>
    %29 = arith.mulf %28, %28 : vector<2x8x128xf32>
    %cst_23 = arith.constant dense<0.000000e+00> : vector<2x128xf32>
    %30 = vector.multi_reduction <add>, %29, %cst_23 [1] : vector<2x8x128xf32> to vector<2x128xf32>
    %31 = vector.shape_cast %30 : vector<2x128xf32> to vector<2x1x128xf32>
    %cst_24 = arith.constant 8.000000e+00 : f32
    %32 = vector.broadcast %cst_24 : f32 to vector<2x1x128xf32>
    %33 = arith.divf %31, %32 : vector<2x1x128xf32>
    %cst_25 = arith.constant 9.99999974E-6 : f32
    %34 = vector.broadcast %cst_25 : f32 to vector<2x1x128xf32>
    %35 = arith.addf %33, %34 : vector<2x1x128xf32>
    %36 = math.rsqrt %35 : vector<2x1x128xf32>
    %37 = vector.broadcast %36 : vector<2x1x128xf32> to vector<2x8x128xf32>
    %38 = arith.mulf %28, %37 : vector<2x8x128xf32>
    %39 = vector.shape_cast %38 : vector<2x8x128xf32> to vector<16x128xf32>
    %40 = vector.broadcast %2 : vector<1x128xf32> to vector<16x128xf32>
    %41 = arith.mulf %39, %40 : vector<16x128xf32>
    %42 = vector.broadcast %4 : vector<1x128xf32> to vector<16x128xf32>
    %43 = arith.addf %41, %42 : vector<16x128xf32>
    %cst_26 = arith.constant 0.000000e+00 : f32
    %44 = vector.broadcast %cst_26 : f32 to vector<16x128xf32>
    %45 = arith.maximumf %43, %44 : vector<16x128xf32>
    %46 = arith.truncf %45 : vector<16x128xf32> to vector<16x128xbf16>
    %c0_27 = arith.constant 0 : index
    %c0_28 = arith.constant 0 : index
    %47 = vector.load %arg7[%c0_27, %c0_28] : memref<128x64xbf16, #tpu.memory_space<vmem>>, vector<128x64xbf16>
    %cst_29 = arith.constant dense<0.000000e+00> : vector<16x64xf32>
    %48 = tpu.matmul %46, %47, %cst_29 {dimension_numbers = #tpu.dot_dimension_numbers<[1], [0], [0], [1], [0, 0, 1, 1], [], []>} : vector<16x128xbf16>, vector<128x64xbf16>, vector<16x64xf32> -> vector<16x64xf32>
    %49 = vector.broadcast %6 : vector<1x64xf32> to vector<16x64xf32>
    %50 = arith.addf %48, %49 : vector<16x64xf32>
    %cst_30 = arith.constant 0.000000e+00 : f32
    %51 = vector.broadcast %cst_30 : f32 to vector<16x64xf32>
    %52 = arith.maximumf %50, %51 : vector<16x64xf32>
    %53 = arith.truncf %52 : vector<16x64xf32> to vector<16x64xbf16>
    %c0_31 = arith.constant 0 : index
    %c0_32 = arith.constant 0 : index
    %54 = vector.load %arg9[%c0_31, %c0_32] : memref<64x128xbf16, #tpu.memory_space<vmem>>, vector<64x128xbf16>
    %cst_33 = arith.constant dense<0.000000e+00> : vector<16x128xf32>
    %55 = tpu.matmul %53, %54, %cst_33 {dimension_numbers = #tpu.dot_dimension_numbers<[1], [0], [0], [1], [0, 0, 1, 1], [], []>} : vector<16x64xbf16>, vector<64x128xbf16>, vector<16x128xf32> -> vector<16x128xf32>
    %56 = vector.shape_cast %55 : vector<16x128xf32> to vector<2x8x128xf32>
    %cst_34 = arith.constant dense<0.000000e+00> : vector<2x128xf32>
    %57 = vector.multi_reduction <add>, %56, %cst_34 [1] : vector<2x8x128xf32> to vector<2x128xf32>
    %58 = vector.shape_cast %57 : vector<2x128xf32> to vector<2x1x128xf32>
    %cst_35 = arith.constant 8.000000e+00 : f32
    %59 = vector.broadcast %cst_35 : f32 to vector<2x1x128xf32>
    %60 = arith.divf %58, %59 : vector<2x1x128xf32>
    %61 = vector.broadcast %60 : vector<2x1x128xf32> to vector<2x8x128xf32>
    %62 = arith.subf %56, %61 : vector<2x8x128xf32>
    %63 = arith.mulf %62, %62 : vector<2x8x128xf32>
    %cst_36 = arith.constant dense<0.000000e+00> : vector<2x128xf32>
    %64 = vector.multi_reduction <add>, %63, %cst_36 [1] : vector<2x8x128xf32> to vector<2x128xf32>
    %65 = vector.shape_cast %64 : vector<2x128xf32> to vector<2x1x128xf32>
    %cst_37 = arith.constant 8.000000e+00 : f32
    %66 = vector.broadcast %cst_37 : f32 to vector<2x1x128xf32>
    %67 = arith.divf %65, %66 : vector<2x1x128xf32>
    %cst_38 = arith.constant 9.99999974E-6 : f32
    %68 = vector.broadcast %cst_38 : f32 to vector<2x1x128xf32>
    %69 = arith.addf %67, %68 : vector<2x1x128xf32>
    %70 = math.rsqrt %69 : vector<2x1x128xf32>
    %71 = vector.broadcast %70 : vector<2x1x128xf32> to vector<2x8x128xf32>
    %72 = arith.mulf %62, %71 : vector<2x8x128xf32>
    %73 = vector.shape_cast %72 : vector<2x8x128xf32> to vector<16x128xf32>
    %74 = vector.broadcast %8 : vector<1x128xf32> to vector<16x128xf32>
    %75 = arith.mulf %73, %74 : vector<16x128xf32>
    %76 = vector.broadcast %9 : vector<1x128xf32> to vector<16x128xf32>
    %77 = arith.addf %75, %76 : vector<16x128xf32>
    %cst_39 = arith.constant 0.000000e+00 : f32
    %78 = vector.broadcast %cst_39 : f32 to vector<16x128xf32>
    %79 = arith.maximumf %77, %78 : vector<16x128xf32>
    %80 = arith.truncf %79 : vector<16x128xf32> to vector<16x128xbf16>
    %c0_40 = arith.constant 0 : index
    %c0_41 = arith.constant 0 : index
    %81 = vector.load %arg10[%c0_40, %c0_41] : memref<128x64xbf16, #tpu.memory_space<vmem>>, vector<128x64xbf16>
    %cst_42 = arith.constant dense<0.000000e+00> : vector<16x64xf32>
    %82 = tpu.matmul %80, %81, %cst_42 {dimension_numbers = #tpu.dot_dimension_numbers<[1], [0], [0], [1], [0, 0, 1, 1], [], []>} : vector<16x128xbf16>, vector<128x64xbf16>, vector<16x64xf32> -> vector<16x64xf32>
    %83 = vector.broadcast %10 : vector<1x64xf32> to vector<16x64xf32>
    %84 = arith.addf %82, %83 : vector<16x64xf32>
    %cst_43 = arith.constant 0.000000e+00 : f32
    %85 = vector.broadcast %cst_43 : f32 to vector<16x64xf32>
    %86 = arith.maximumf %84, %85 : vector<16x64xf32>
    %c0_44 = arith.constant 0 : index
    %c0_45 = arith.constant 0 : index
    %87 = vector.load %arg4[%c0_44, %c0_45] : memref<1024x64xbf16, #tpu.memory_space<vmem>>, vector<1024x64xbf16>
    %cst_46 = arith.constant dense<0.000000e+00> : vector<16x64xf32>
    %88 = tpu.matmul %12, %87, %cst_46 {dimension_numbers = #tpu.dot_dimension_numbers<[1], [0], [0], [1], [0, 0, 1, 1], [], []>} : vector<16x1024xbf16>, vector<1024x64xbf16>, vector<16x64xf32> -> vector<16x64xf32>
    %89 = vector.broadcast %1 : vector<1x64xf32> to vector<16x64xf32>
    %90 = arith.addf %88, %89 : vector<16x64xf32>
    %cst_47 = arith.constant 0.000000e+00 : f32
    %91 = vector.broadcast %cst_47 : f32 to vector<16x64xf32>
    %92 = arith.maximumf %90, %91 : vector<16x64xf32>
    %93 = arith.truncf %92 : vector<16x64xf32> to vector<16x64xbf16>
    %c0_48 = arith.constant 0 : index
    %c0_49 = arith.constant 0 : index
    %94 = vector.load %arg6[%c0_48, %c0_49] : memref<64x128xbf16, #tpu.memory_space<vmem>>, vector<64x128xbf16>
    %cst_50 = arith.constant dense<0.000000e+00> : vector<16x128xf32>
    %95 = tpu.matmul %93, %94, %cst_50 {dimension_numbers = #tpu.dot_dimension_numbers<[1], [0], [0], [1], [0, 0, 1, 1], [], []>} : vector<16x64xbf16>, vector<64x128xbf16>, vector<16x128xf32> -> vector<16x128xf32>
    %96 = vector.shape_cast %95 : vector<16x128xf32> to vector<2x8x128xf32>
    %cst_51 = arith.constant dense<0.000000e+00> : vector<2x128xf32>
    %97 = vector.multi_reduction <add>, %96, %cst_51 [1] : vector<2x8x128xf32> to vector<2x128xf32>
    %98 = vector.shape_cast %97 : vector<2x128xf32> to vector<2x1x128xf32>
    %cst_52 = arith.constant 8.000000e+00 : f32
    %99 = vector.broadcast %cst_52 : f32 to vector<2x1x128xf32>
    %100 = arith.divf %98, %99 : vector<2x1x128xf32>
    %101 = vector.broadcast %100 : vector<2x1x128xf32> to vector<2x8x128xf32>
    %102 = arith.subf %96, %101 : vector<2x8x128xf32>
    %103 = arith.mulf %102, %102 : vector<2x8x128xf32>
    %cst_53 = arith.constant dense<0.000000e+00> : vector<2x128xf32>
    %104 = vector.multi_reduction <add>, %103, %cst_53 [1] : vector<2x8x128xf32> to vector<2x128xf32>
    %105 = vector.shape_cast %104 : vector<2x128xf32> to vector<2x1x128xf32>
    %cst_54 = arith.constant 8.000000e+00 : f32
    %106 = vector.broadcast %cst_54 : f32 to vector<2x1x128xf32>
    %107 = arith.divf %105, %106 : vector<2x1x128xf32>
    %cst_55 = arith.constant 9.99999974E-6 : f32
    %108 = vector.broadcast %cst_55 : f32 to vector<2x1x128xf32>
    %109 = arith.addf %107, %108 : vector<2x1x128xf32>
    %110 = math.rsqrt %109 : vector<2x1x128xf32>
    %111 = vector.broadcast %110 : vector<2x1x128xf32> to vector<2x8x128xf32>
    %112 = arith.mulf %102, %111 : vector<2x8x128xf32>
    %113 = vector.shape_cast %112 : vector<2x8x128xf32> to vector<16x128xf32>
    %114 = vector.broadcast %3 : vector<1x128xf32> to vector<16x128xf32>
    %115 = arith.mulf %113, %114 : vector<16x128xf32>
    %116 = vector.broadcast %5 : vector<1x128xf32> to vector<16x128xf32>
    %117 = arith.addf %115, %116 : vector<16x128xf32>
    %cst_56 = arith.constant 0.000000e+00 : f32
    %118 = vector.broadcast %cst_56 : f32 to vector<16x128xf32>
    %119 = arith.maximumf %117, %118 : vector<16x128xf32>
    %120 = arith.truncf %119 : vector<16x128xf32> to vector<16x128xbf16>
    %c0_57 = arith.constant 0 : index
    %c0_58 = arith.constant 0 : index
    %121 = vector.load %arg8[%c0_57, %c0_58] : memref<128x64xbf16, #tpu.memory_space<vmem>>, vector<128x64xbf16>
    %cst_59 = arith.constant dense<0.000000e+00> : vector<16x64xf32>
    %122 = tpu.matmul %120, %121, %cst_59 {dimension_numbers = #tpu.dot_dimension_numbers<[1], [0], [0], [1], [0, 0, 1, 1], [], []>} : vector<16x128xbf16>, vector<128x64xbf16>, vector<16x64xf32> -> vector<16x64xf32>
    %123 = vector.broadcast %7 : vector<1x64xf32> to vector<16x64xf32>
    %124 = arith.addf %122, %123 : vector<16x64xf32>
    %cst_60 = arith.constant 0.000000e+00 : f32
    %125 = vector.broadcast %cst_60 : f32 to vector<16x64xf32>
    %126 = arith.maximumf %124, %125 : vector<16x64xf32>
    %127 = vector.extract_strided_slice %86 {offsets = [0, 0], sizes = [8, 64], strides = [1, 1]} : vector<16x64xf32> to vector<8x64xf32>
    %128 = vector.extract_strided_slice %126 {offsets = [8, 0], sizes = [8, 64], strides = [1, 1]} : vector<16x64xf32> to vector<8x64xf32>
    %129 = arith.mulf %127, %128 : vector<8x64xf32>
    %cst_61 = arith.constant dense<0.000000e+00> : vector<8xf32>
    %130 = vector.multi_reduction <add>, %129, %cst_61 [1] : vector<8x64xf32> to vector<8xf32>
    %131 = vector.shape_cast %130 : vector<8xf32> to vector<8x1xf32>
    %132 = arith.mulf %127, %127 : vector<8x64xf32>
    %cst_62 = arith.constant dense<0.000000e+00> : vector<8xf32>
    %133 = vector.multi_reduction <add>, %132, %cst_62 [1] : vector<8x64xf32> to vector<8xf32>
    %134 = vector.shape_cast %133 : vector<8xf32> to vector<8x1xf32>
    %135 = arith.mulf %128, %128 : vector<8x64xf32>
    %cst_63 = arith.constant dense<0.000000e+00> : vector<8xf32>
    %136 = vector.multi_reduction <add>, %135, %cst_63 [1] : vector<8x64xf32> to vector<8xf32>
    %137 = vector.shape_cast %136 : vector<8xf32> to vector<8x1xf32>
    %cst_64 = arith.constant 1.000000e-24 : f32
    %138 = vector.broadcast %cst_64 : f32 to vector<8x1xf32>
    %139 = arith.maximumf %134, %138 : vector<8x1xf32>
    %140 = math.rsqrt %139 : vector<8x1xf32>
    %141 = arith.mulf %131, %140 : vector<8x1xf32>
    %cst_65 = arith.constant 1.000000e-24 : f32
    %142 = vector.broadcast %cst_65 : f32 to vector<8x1xf32>
    %143 = arith.maximumf %137, %142 : vector<8x1xf32>
    %144 = math.rsqrt %143 : vector<8x1xf32>
    %145 = arith.mulf %141, %144 : vector<8x1xf32>
    %cst_66 = arith.constant 2.000000e+00 : f32
    %146 = vector.broadcast %cst_66 : f32 to vector<8x1xf32>
    %147 = arith.mulf %146, %145 : vector<8x1xf32>
    %cst_67 = arith.constant 2.000000e+00 : f32
    %148 = vector.broadcast %cst_67 : f32 to vector<8x1xf32>
    %149 = arith.subf %148, %147 : vector<8x1xf32>
    %150 = vector.shape_cast %149 : vector<8x1xf32> to vector<1x8x1xf32>
    %cst_68 = arith.constant dense<0.000000e+00> : vector<1xf32>
    %151 = vector.multi_reduction <add>, %150, %cst_68 [1, 2] : vector<1x8x1xf32> to vector<1xf32>
    %152 = vector.shape_cast %151 : vector<1xf32> to vector<1x1x1xf32>
    %153 = vector.extract %152[0, 0, 0] : f32 from vector<1x1x1xf32>
    %154 = vector.extract_strided_slice %86 {offsets = [8, 0], sizes = [8, 64], strides = [1, 1]} : vector<16x64xf32> to vector<8x64xf32>
    %155 = vector.extract_strided_slice %126 {offsets = [0, 0], sizes = [8, 64], strides = [1, 1]} : vector<16x64xf32> to vector<8x64xf32>
    %156 = arith.mulf %154, %155 : vector<8x64xf32>
    %cst_69 = arith.constant dense<0.000000e+00> : vector<8xf32>
    %157 = vector.multi_reduction <add>, %156, %cst_69 [1] : vector<8x64xf32> to vector<8xf32>
    %158 = vector.shape_cast %157 : vector<8xf32> to vector<8x1xf32>
    %159 = arith.mulf %154, %154 : vector<8x64xf32>
    %cst_70 = arith.constant dense<0.000000e+00> : vector<8xf32>
    %160 = vector.multi_reduction <add>, %159, %cst_70 [1] : vector<8x64xf32> to vector<8xf32>
    %161 = vector.shape_cast %160 : vector<8xf32> to vector<8x1xf32>
    %162 = arith.mulf %155, %155 : vector<8x64xf32>
    %cst_71 = arith.constant dense<0.000000e+00> : vector<8xf32>
    %163 = vector.multi_reduction <add>, %162, %cst_71 [1] : vector<8x64xf32> to vector<8xf32>
    %164 = vector.shape_cast %163 : vector<8xf32> to vector<8x1xf32>
    %cst_72 = arith.constant 1.000000e-24 : f32
    %165 = vector.broadcast %cst_72 : f32 to vector<8x1xf32>
    %166 = arith.maximumf %161, %165 : vector<8x1xf32>
    %167 = math.rsqrt %166 : vector<8x1xf32>
    %168 = arith.mulf %158, %167 : vector<8x1xf32>
    %cst_73 = arith.constant 1.000000e-24 : f32
    %169 = vector.broadcast %cst_73 : f32 to vector<8x1xf32>
    %170 = arith.maximumf %164, %169 : vector<8x1xf32>
    %171 = math.rsqrt %170 : vector<8x1xf32>
    %172 = arith.mulf %168, %171 : vector<8x1xf32>
    %cst_74 = arith.constant 2.000000e+00 : f32
    %173 = vector.broadcast %cst_74 : f32 to vector<8x1xf32>
    %174 = arith.mulf %173, %172 : vector<8x1xf32>
    %cst_75 = arith.constant 2.000000e+00 : f32
    %175 = vector.broadcast %cst_75 : f32 to vector<8x1xf32>
    %176 = arith.subf %175, %174 : vector<8x1xf32>
    %177 = vector.shape_cast %176 : vector<8x1xf32> to vector<1x8x1xf32>
    %cst_76 = arith.constant dense<0.000000e+00> : vector<1xf32>
    %178 = vector.multi_reduction <add>, %177, %cst_76 [1, 2] : vector<1x8x1xf32> to vector<1xf32>
    %179 = vector.shape_cast %178 : vector<1xf32> to vector<1x1x1xf32>
    %180 = vector.extract %179[0, 0, 0] : f32 from vector<1x1x1xf32>
    %181 = arith.addf %153, %180 : f32
    %182 = vector.broadcast %181 : f32 to vector<1x8x128xf32>
    %c0_77 = arith.constant 0 : index
    %c0_78 = arith.constant 0 : index
    %c0_79 = arith.constant 0 : index
    %183 = vector.load %arg12[%c0_77, %c0_78, %c0_79] : memref<1x8x128xf32, #tpu.memory_space<vmem>>, vector<1x8x128xf32>
    tpu.vector_store %arg12[%c0_77, %c0_78, %c0_79], %182 {strides = array<i32>} : memref<1x8x128xf32, #tpu.memory_space<vmem>>, vector<1x8x128xf32>,
    return
  }
  func.func @transform_0(%arg0: i32) -> (i32, i32) {
    %c0_i32 = arith.constant 0 : i32
    %c0_i32_0 = arith.constant 0 : i32
    %c0_i32_1 = arith.constant 0 : i32
    return %c0_i32, %c0_i32_0 : i32, i32
  }
  func.func @transform_1(%arg0: i32) -> (i32, i32) {
    %c0_i32 = arith.constant 0 : i32
    %c0_i32_0 = arith.constant 0 : i32
    %c0_i32_1 = arith.constant 0 : i32
    return %c0_i32, %c0_i32_0 : i32, i32
  }
  func.func @transform_2(%arg0: i32) -> (i32, i32) {
    %c0_i32 = arith.constant 0 : i32
    %c0_i32_0 = arith.constant 0 : i32
    %c0_i32_1 = arith.constant 0 : i32
    return %c0_i32, %c0_i32_0 : i32, i32
  }
  func.func @transform_3(%arg0: i32) -> (i32, i32) {
    %c0_i32 = arith.constant 0 : i32
    %c0_i32_0 = arith.constant 0 : i32
    %c0_i32_1 = arith.constant 0 : i32
    return %c0_i32, %c0_i32_0 : i32, i32
  }
  func.func @transform_4(%arg0: i32) -> (i32, i32) {
    %c0_i32 = arith.constant 0 : i32
    %c0_i32_0 = arith.constant 0 : i32
    %c0_i32_1 = arith.constant 0 : i32
    return %c0_i32, %c0_i32_0 : i32, i32
  }
  func.func @transform_5(%arg0: i32) -> (i32, i32) {
    %c0_i32 = arith.constant 0 : i32
    %c0_i32_0 = arith.constant 0 : i32
    %c0_i32_1 = arith.constant 0 : i32
    return %c0_i32, %c0_i32_0 : i32, i32
  }
  func.func @transform_6(%arg0: i32) -> (i32, i32) {
    %c0_i32 = arith.constant 0 : i32
    %c0_i32_0 = arith.constant 0 : i32
    %c0_i32_1 = arith.constant 0 : i32
    return %c0_i32, %c0_i32_0 : i32, i32
  }
  func.func @transform_7(%arg0: i32) -> (i32, i32) {
    %c0_i32 = arith.constant 0 : i32
    %c0_i32_0 = arith.constant 0 : i32
    %c0_i32_1 = arith.constant 0 : i32
    return %c0_i32, %c0_i32_0 : i32, i32
  }
  func.func @transform_8(%arg0: i32) -> (i32, i32) {
    %c0_i32 = arith.constant 0 : i32
    %c0_i32_0 = arith.constant 0 : i32
    %c0_i32_1 = arith.constant 0 : i32
    return %c0_i32, %c0_i32_0 : i32, i32
  }
  func.func @transform_9(%arg0: i32) -> (i32, i32) {
    %c0_i32 = arith.constant 0 : i32
    %c0_i32_0 = arith.constant 0 : i32
    %c0_i32_1 = arith.constant 0 : i32
    return %c0_i32, %c0_i32_0 : i32, i32
  }
  func.func @transform_10(%arg0: i32) -> (i32, i32) {
    %c0_i32 = arith.constant 0 : i32
    %c0_i32_0 = arith.constant 0 : i32
    %c0_i32_1 = arith.constant 0 : i32
    return %c0_i32, %c0_i32_0 : i32, i32
  }
  func.func @transform_11(%arg0: i32) -> (i32, i32, i32) {
    %c0_i32 = arith.constant 0 : i32
    %c0_i32_0 = arith.constant 0 : i32
    %c0_i32_1 = arith.constant 0 : i32
    return %arg0, %c0_i32, %c0_i32_0 : i32, i32, i32
  }
}

</mosaic_0001>

<bundles_post_ra>
// kernel: byol_forward.1
= control target key start
LH: loop header
LB: loop body
LE: loop exit
PB: predicated region body
PF: predicated region fallthrough
CT: control target
= control target key end

     0   :  { %vm3002_vm0 = vmmov 0   ;;  %vm821_vm1 = vcmask 523264   ;;  %vm2255_vm2 = vcmask 7168   ;;  %s3706_s2 = inlined_call_operand.vmem [shape: bf16[1024,64], index: 2, kind: input, shape index: {}]   ;;  %s3707_s0 = inlined_call_operand.vmem [shape: bf16[16,1024], index: 0, kind: input, shape index: {}, may-alias: {0,1}]   ;;  %s3708_s4 = inlined_call_operand.vmem [shape: bf16[64,128], index: 4, kind: input, shape index: {}]   ;;  %s3709_s10 = inlined_call_operand.vmem [shape: f32[16,128], index: 10, kind: input, shape index: {}]   ;;  %s3710_s6 = inlined_call_operand.vmem [shape: bf16[128,64], index: 6, kind: input, shape index: {}]   ;;  %s3711_s8 = inlined_call_operand.vmem [shape: bf16[64,128], index: 8, kind: input, shape index: {}]   ;;  %s3712_s9 = inlined_call_operand.vmem [shape: bf16[128,64], index: 9, kind: input, shape index: {}]   ;;  %s3713_s3 = inlined_call_operand.vmem [shape: bf16[1024,64], index: 3, kind: input, shape index: {}]   ;;  %s3714_s1 = inlined_call_operand.vmem [shape: bf16[16,1024], index: 1, kind: input, shape index: {}, may-alias: {0,1}]   ;;  %s3715_s5 = inlined_call_operand.vmem [shape: bf16[64,128], index: 5, kind: input, shape index: {}]   ;;  %s3716_s7 = inlined_call_operand.vmem [shape: bf16[128,64], index: 7, kind: input, shape index: {}]   ;;  %s3717_s11 = inlined_call_operand.vmem [shape: f32[1,8,128], index: 11, kind: output, shape index: {}]  }
   0x1   :  { %v2817_v0 = vld [vmem:[%s3706_s2 + $0x78] sm:$0xff]   ;;  %v2821_v4 = vld [vmem:[%s3706_s2 + $0x70] sm:$0xff]   ;;  %v2825_v8 = vld [vmem:[%s3706_s2 + $0x68] sm:$0xff]  }
   0x2   :  { %v2818_v1 = vld [vmem:[%s3706_s2 + $0xf8] sm:$0xff]   ;;  %2497 = vmatprep.subr.bf16.mxu0 %v2817_v0  ;;  %v2822_v5 = vld [vmem:[%s3706_s2 + $0xf0] sm:$0xff]   ;;  %v2826_v9 = vld [vmem:[%s3706_s2 + $0xe8] sm:$0xff]  }
   0x3   :  { %v2819_v2 = vld [vmem:[%s3706_s2 + $0x38] sm:$0xff]   ;;  %2519 = vmatprep.subr.bf16.mxu1 %v2818_v1  ;;  %v2823_v6 = vld [vmem:[%s3706_s2 + $0x30] sm:$0xff]   ;;  %v2827_v10 = vld [vmem:[%s3706_s2 + $0x28] sm:$0xff]  }
   0x4   :  { %v2820_v3 = vld [vmem:[%s3706_s2 + $0xb8] sm:$0xff]   ;;  %2498 = vmatpush3.bf16.msra.mxu0 %v2819_v2  ;;  %v2824_v7 = vld [vmem:[%s3706_s2 + $0xb0] sm:$0xff]   ;;  %v2828_v11 = vld [vmem:[%s3706_s2 + $0xa8] sm:$0xff]  }
   0x5   :  { %2520 = vmatpush3.bf16.msra.mxu1 %v2820_v3  ;;  %2499 = vmatprep.subr.bf16.mxu0 %v2821_v4  ;;  %v2829_v12 = vld [vmem:[%s3706_s2 + $0x60] sm:$0xff]   ;;  %v2833_v16 = vld [vmem:[%s3706_s2 + $0x58] sm:$0xff]   ;;  %v2837_v20 = vld [vmem:[%s3706_s2 + $0x50] sm:$0xff]  }
   0x6   :  { %2521 = vmatprep.subr.bf16.mxu1 %v2822_v5  ;;  %v2830_v13 = vld [vmem:[%s3706_s2 + $0xe0] sm:$0xff]   ;;  %v2834_v17 = vld [vmem:[%s3706_s2 + $0xd8] sm:$0xff]   ;;  %v2838_v21 = vld [vmem:[%s3706_s2 + $0xd0] sm:$0xff]  }
   0x7   :  { %v2831_v14 = vld [vmem:[%s3706_s2 + $0x20] sm:$0xff]   ;;  %v2835_v18 = vld [vmem:[%s3706_s2 + $0x18] sm:$0xff]   ;;  %v2839_v22 = vld [vmem:[%s3706_s2 + $0x10] sm:$0xff]  }
   0x8   :  { %2500 = vmatpush3.bf16.msra.mxu0 %v2823_v6  ;;  %v2832_v15 = vld [vmem:[%s3706_s2 + $0xa0] sm:$0xff]   ;;  %v2836_v19 = vld [vmem:[%s3706_s2 + $0x98] sm:$0xff]   ;;  %v2840_v23 = vld [vmem:[%s3706_s2 + $0x90] sm:$0xff]  }
   0x9   :  { %2522 = vmatpush3.bf16.msra.mxu1 %v2824_v7  ;;  %2501 = vmatprep.subr.bf16.mxu0 %v2825_v8  ;;  %v2841_v24 = vld [vmem:[%s3706_s2 + $0x48] sm:$0xff]   ;;  %v2845_v28 = vld [vmem:[%s3706_s2 + $0x40] sm:$0xff]   ;;  %v2849_v40 = vld [vmem:[%s3706_s2 + $0x178] sm:$0xff]  }
   0xa   :  { %2523 = vmatprep.subr.bf16.mxu1 %v2826_v9  ;;  %v2842_v25 = vld [vmem:[%s3706_s2 + $0xc8] sm:$0xff]   ;;  %v2846_v29 = vld [vmem:[%s3706_s2 + $0xc0] sm:$0xff]   ;;  %v2850_v41 = vld [vmem:[%s3706_s2 + $0x1f8] sm:$0xff]  }
   0xb   :  { %v2843_v26 = vld [vmem:[%s3706_s2 + $0x8] sm:$0xff]   ;;  %v2847_v30 = vld [vmem:[%s3706_s2] sm:$0xff]   ;;  %v2851_v42 = vld [vmem:[%s3706_s2 + $0x138] sm:$0xff]  }
   0xc   :  { %2502 = vmatpush3.bf16.msra.mxu0 %v2827_v10  ;;  %v2844_v27 = vld [vmem:[%s3706_s2 + $0x88] sm:$0xff]   ;;  %v2848_v31 = vld [vmem:[%s3706_s2 + $0x80] sm:$0xff]   ;;  %v2852_v43 = vld [vmem:[%s3706_s2 + $0x1b8] sm:$0xff]  }
   0xd   :  { %2524 = vmatpush3.bf16.msra.mxu1 %v2828_v11  ;;  %2503 = vmatprep.subr.bf16.mxu0 %v2829_v12  ;;  %v50_v32 = vld [vmem:[%s3707_s0] sm:$0xff]  ;;  %v51_v34 = vld [vmem:[%s3707_s0 + $0x8] sm:$0xff]  ;;  %v2853_v44 = vld [vmem:[%s3706_s2 + $0x170] sm:$0xff]  }
   0xe   :  { %2525 = vmatprep.subr.bf16.mxu1 %v2830_v13  ;;  %v54_v33 = vld [vmem:[%s3707_s0 + $0x20] sm:$0xff]  ;;  %v55_v37 = vld [vmem:[%s3707_s0 + $0x28] sm:$0xff]  ;;  %v2854_v45 = vld [vmem:[%s3706_s2 + $0x1f0] sm:$0xff]  }
   0xf   :  { %v2304_v35 = vcombine.low %v50_v32, %v54_v33  ;;  %v2305_v36 = vcombine.high %v50_v32, %v54_v33  ;;  %v2306_v38 = vcombine.low %v51_v34, %v55_v37  ;;  %v2307_v39 = vcombine.high %v51_v34, %v55_v37  ;;  %v2855_v46 = vld [vmem:[%s3706_s2 + $0x130] sm:$0xff]   ;;  %v2857_v48 = vld [vmem:[%s3706_s2 + $0x168] sm:$0xff]   ;;  %v2861_v52 = vld [vmem:[%s3706_s2 + $0x160] sm:$0xff]  }
  0x10   :  { %2504 = vmatpush3.bf16.msra.mxu0 %v2831_v14  ;;  %v2856_v47 = vld [vmem:[%s3706_s2 + $0x1b0] sm:$0xff]   ;;  %v2858_v49 = vld [vmem:[%s3706_s2 + $0x1e8] sm:$0xff]   ;;  %v2862_v53 = vld [vmem:[%s3706_s2 + $0x1e0] sm:$0xff]  }
  0x11   :  { %2526 = vmatpush3.bf16.msra.mxu1 %v2832_v15  ;;  %2505 = vmatprep.subr.bf16.mxu0 %v2833_v16  ;;  %v2859_v50 = vld [vmem:[%s3706_s2 + $0x128] sm:$0xff]   ;;  %v2863_v54 = vld [vmem:[%s3706_s2 + $0x120] sm:$0xff]   ;;  %v2865_v56 = vld [vmem:[%s3706_s2 + $0x158] sm:$0xff]  }
  0x12   :  { %2527 = vmatprep.subr.bf16.mxu1 %v2834_v17  ;;  %654 = vmatprep.mubr.bf16.mxu0 %v2305_v36  ;;  %v2860_v51 = vld [vmem:[%s3706_s2 + $0x1a8] sm:$0xff]   ;;  %v2864_v55 = vld [vmem:[%s3706_s2 + $0x1a0] sm:$0xff]   ;;  %v2866_v57 = vld [vmem:[%s3706_s2 + $0x1d8] sm:$0xff]   ;;  %v3001_v17 = vmov 0.0  }
  0x13   :  { %695 = vmatprep.mubr.bf16.mxu1 %v2307_v39  ;;  %v2867_v58 = vld [vmem:[%s3706_s2 + $0x118] sm:$0xff]   ;;  %v2869_v60 = vld [vmem:[%s3706_s2 + $0x150] sm:$0xff]   ;;  %v2873_v0 = vld [vmem:[%s3706_s2 + $0x148] sm:$0xff]  }
  0x14   :  { %2506 = vmatpush3.bf16.msra.mxu0 %v2835_v18  ;;  %v2868_v59 = vld [vmem:[%s3706_s2 + $0x198] sm:$0xff]   ;;  %v2870_v61 = vld [vmem:[%s3706_s2 + $0x1d0] sm:$0xff]   ;;  %v2874_v1 = vld [vmem:[%s3706_s2 + $0x1c8] sm:$0xff]  }
  0x15   :  { %2528 = vmatpush3.bf16.msra.mxu1 %v2836_v19  ;;  %2507 = vmatprep.subr.bf16.mxu0 %v2837_v20  ;;  %v2871_v62 = vld [vmem:[%s3706_s2 + $0x110] sm:$0xff]   ;;  %v2875_v2 = vld [vmem:[%s3706_s2 + $0x108] sm:$0xff]   ;;  %v2877_v4 = vld [vmem:[%s3706_s2 + $0x140] sm:$0xff]  }
  0x16   :  { %2529 = vmatprep.subr.bf16.mxu1 %v2838_v21  ;;  %v2872_v63 = vld [vmem:[%s3706_s2 + $0x190] sm:$0xff]   ;;  %v2876_v3 = vld [vmem:[%s3706_s2 + $0x188] sm:$0xff]   ;;  %v2878_v5 = vld [vmem:[%s3706_s2 + $0x1c0] sm:$0xff]  }
  0x17   :  { %v2879_v6 = vld [vmem:[%s3706_s2 + $0x100] sm:$0xff]   ;;  %v52_v8 = vld [vmem:[%s3707_s0 + $0x10] sm:$0xff]  ;;  %v53_v12 = vld [vmem:[%s3707_s0 + $0x18] sm:$0xff] }
  0x18   :  { %2508 = vmatpush3.bf16.msra.mxu0 %v2839_v22  ;;  %v2880_v7 = vld [vmem:[%s3706_s2 + $0x180] sm:$0xff]   ;;  %v56_v9 = vld [vmem:[%s3707_s0 + $0x30] sm:$0xff]  ;;  %v57_v13 = vld [vmem:[%s3707_s0 + $0x38] sm:$0xff] }
  0x19   :  { %2530 = vmatpush3.bf16.msra.mxu1 %v2840_v23  ;;  %2509 = vmatprep.subr.bf16.mxu0 %v2841_v24  ;;  %v2308_v10 = vcombine.low %v52_v8, %v56_v9  ;;  %v2309_v11 = vcombine.high %v52_v8, %v56_v9  ;;  %v2310_v14 = vcombine.low %v53_v12, %v57_v13  ;;  %v2881_v16 = vld [vmem:[%s3708_s4 + $0x18] sm:$0xff]   ;;  %v2882_v18 = vld [vmem:[%s3708_s4 + $0x10] sm:$0xff]   ;;  %v2883_v19 = vld [vmem:[%s3708_s4 + $0x8] sm:$0xff]  }
  0x1a   :  { %2531 = vmatprep.subr.bf16.mxu1 %v2842_v25  ;;  %v2311_v15 = vcombine.high %v53_v12, %v57_v13  ;;  %v2884_v20 = vld [vmem:[%s3708_s4] sm:$0xff]  }
  0x1c   :  { %2510 = vmatpush3.bf16.msra.mxu0 %v2843_v26 }
  0x1d   :  { %2532 = vmatpush3.bf16.msra.mxu1 %v2844_v27  ;;  %2511 = vmatprep.subr.bf16.mxu0 %v2845_v28  ;;  %v2303_v28 = vld [vmem:[%s3709_s10] ss:$0 sm:$0xff] }
  0x1e   :  { %2533 = vmatprep.subr.bf16.mxu1 %v2846_v29 }
  0x20   :  { %2512 = vmatpush3.bf16.msra.mxu0 %v2847_v30 }
  0x21   :  { %2534 = vmatpush3.bf16.msra.mxu1 %v2848_v31  ;;  %2541 = vmatprep.subr.bf16.mxu0 %v2849_v40 }
  0x22   :  { %2563 = vmatprep.subr.bf16.mxu1 %v2850_v41 }
  0x23   :  { %655 = vmatmul.mubr.bf16.vlgmr.msra.gmra.mxu0 %v2304_v35 }
  0x24   :  { %696 = vmatmul.mubr.bf16.vlgmr.msra.gmra.mxu1 %v2306_v38  ;;  %2542 = vmatpush3.bf16.msra.mxu0 %v2851_v42 }
  0x25   :  { %2564 = vmatpush3.bf16.msra.mxu1 %v2852_v43  ;;  %2543 = vmatprep.subr.bf16.mxu0 %v2853_v44 }
  0x26   :  { %2565 = vmatprep.subr.bf16.mxu1 %v2854_v45  ;;  %736 = vmatprep.mubr.bf16.mxu0 %v2309_v11 }
  0x27   :  { %777 = vmatprep.mubr.bf16.mxu1 %v2311_v15 }
  0x28   :  { %2544 = vmatpush3.bf16.msra.mxu0 %v2855_v46 }
  0x29   :  { %2566 = vmatpush3.bf16.msra.mxu1 %v2856_v47  ;;  %2545 = vmatprep.subr.bf16.mxu0 %v2857_v48 }
  0x2a   :  { %2567 = vmatprep.subr.bf16.mxu1 %v2858_v49 }
  0x2c   :  { %2546 = vmatpush3.bf16.msra.mxu0 %v2859_v50 }
  0x2d   :  { %2568 = vmatpush3.bf16.msra.mxu1 %v2860_v51  ;;  %2547 = vmatprep.subr.bf16.mxu0 %v2861_v52 }
  0x2e   :  { %2569 = vmatprep.subr.bf16.mxu1 %v2862_v53 }
  0x30   :  { %2548 = vmatpush3.bf16.msra.mxu0 %v2863_v54 }
  0x31   :  { %2570 = vmatpush3.bf16.msra.mxu1 %v2864_v55  ;;  %2549 = vmatprep.subr.bf16.mxu0 %v2865_v56 }
  0x32   :  { %2571 = vmatprep.subr.bf16.mxu1 %v2866_v57  ;;  %v2885_v57 = vld [vmem:[%s3710_s6 + $0x38] sm:$0xff]  }
  0x34   :  { %2550 = vmatpush3.bf16.msra.mxu0 %v2867_v58  ;;  %v2886_v58 = vld [vmem:[%s3710_s6 + $0x30] sm:$0xff]  }
  0x35   :  { %2572 = vmatpush3.bf16.msra.mxu1 %v2868_v59  ;;  %2551 = vmatprep.subr.bf16.mxu0 %v2869_v60  ;;  %v2887_v59 = vld [vmem:[%s3710_s6 + $0x28] sm:$0xff]   ;;  %v2888_v60 = vld [vmem:[%s3710_s6 + $0x20] sm:$0xff]  }
  0x36   :  { %2573 = vmatprep.subr.bf16.mxu1 %v2870_v61  ;;  %v2889_v61 = vld [vmem:[%s3710_s6 + $0x18] sm:$0xff]  }
  0x38   :  { %2552 = vmatpush3.bf16.msra.mxu0 %v2871_v62  ;;  %v2890_v62 = vld [vmem:[%s3710_s6 + $0x10] sm:$0xff]  }
  0x39   :  { %2574 = vmatpush3.bf16.msra.mxu1 %v2872_v63  ;;  %2553 = vmatprep.subr.bf16.mxu0 %v2873_v0  ;;  %v2891_v63 = vld [vmem:[%s3710_s6 + $0x8] sm:$0xff]   ;;  %v2892_v0 = vld [vmem:[%s3710_s6] sm:$0xff]  }
  0x3a   :  { %2575 = vmatprep.subr.bf16.mxu1 %v2874_v1  ;;  %v2893_v1 = vld [vmem:[%s3711_s8 + $0x18] sm:$0xff]  }
  0x3c   :  { %2554 = vmatpush3.bf16.msra.mxu0 %v2875_v2 }
  0x3d   :  { %2576 = vmatpush3.bf16.msra.mxu1 %v2876_v3  ;;  %2555 = vmatprep.subr.bf16.mxu0 %v2877_v4 }
  0x3e   :  { %2577 = vmatprep.subr.bf16.mxu1 %v2878_v5 }
  0x40   :  { %2556 = vmatpush3.bf16.msra.mxu0 %v2879_v6 }
  0x41   :  { %2578 = vmatpush3.bf16.msra.mxu1 %v2880_v7  ;;  %2715 = vmatprep.subr.bf16.mxu0 %v3001_v17 }
  0x42   :  { %2727 = vmatprep.subr.bf16.mxu1 %v3001_v17 }
  0x43   :  { %737 = vmatmul.mubr.bf16.vlgmr.msra.gmra.mxu0 %v2308_v10 }
  0x44   :  { %778 = vmatmul.mubr.bf16.vlgmr.msra.gmra.mxu1 %v2310_v14  ;;  %2716 = vmatpush3.bf16.msra.mxu0 %v2881_v16 }
  0x45   :  { %2717 = vmatprep.subr.bf16.mxu0 %v3001_v17  ;;  %2723 = vmatprep.mubr.msk.bf16.mxu0 %vm3002_vm0, %v3001_v17 }
  0x46   :  { %2743 = vmatprep.mubr.msk.bf16.mxu1 %vm3002_vm0, %v3001_v17  ;;  %2728 = vmatpush3.bf16.msra.mxu1 %v2885_v57  ;;  %v2383_v57 = vld [vmem:[%s3709_s10 + $0x6] ss:$0 sm:$0xff] }
  0x47   :  { %2729 = vmatprep.subr.bf16.mxu1 %v3001_v17 }
  0x48   :  { %2718 = vmatpush3.bf16.msra.mxu0 %v2882_v18 }
  0x49   :  { %2719 = vmatprep.subr.bf16.mxu0 %v3001_v17 }
  0x4a   :  { %2730 = vmatpush3.bf16.msra.mxu1 %v2886_v58 }
  0x4b   :  { %2731 = vmatprep.subr.bf16.mxu1 %v3001_v17 }
  0x4c   :  { %2720 = vmatpush3.bf16.msra.mxu0 %v2883_v19 }
  0x4d   :  { %2721 = vmatprep.subr.bf16.mxu0 %v3001_v17 }
  0x4e   :  { %2732 = vmatpush3.bf16.msra.mxu1 %v2887_v59 }
  0x4f   :  { %2733 = vmatprep.subr.bf16.mxu1 %v3001_v17 }
  0x50   :  { %2722 = vmatpush3.bf16.msra.mxu0 %v2884_v20 }
  0x51   :  { %2747 = vmatprep.subr.bf16.mxu0 %v3001_v17 }
  0x52   :  { %2734 = vmatpush3.bf16.msra.mxu1 %v2888_v60 }
  0x53   :  { %2735 = vmatprep.subr.bf16.mxu1 %v3001_v17 }
  0x56   :  { %2736 = vmatpush3.bf16.msra.mxu1 %v2889_v61 }
  0x57   :  { %2737 = vmatprep.subr.bf16.mxu1 %v3001_v17 }
  0x5a   :  { %2738 = vmatpush3.bf16.msra.mxu1 %v2890_v62 }
  0x5b   :  { %2739 = vmatprep.subr.bf16.mxu1 %v3001_v17 }
  0x5e   :  { %2740 = vmatpush3.bf16.msra.mxu1 %v2891_v63 }
  0x5f   :  { %2741 = vmatprep.subr.bf16.mxu1 %v3001_v17 }
  0x62   :  { %2742 = vmatpush3.bf16.msra.mxu1 %v2892_v0 }
  0xe3   :  { %v2513_v21 = vpop.f32.mrf.mxu0 }
  0xe4   :  { %v2535_v22 = vpop.f32.mrf.mxu1 }
  0xe5   :  { %v2514_v23 = vpop.f32.mrf.mxu0 }
  0xe6   :  { %v2536_v24 = vpop.f32.mrf.mxu1  ;;  %v2515_v26 = vadd.f32 %v2514_v23, %v2513_v21 }
  0xe7   :  { %v2516_v25 = vpop.f32.mrf.mxu0  ;;  %v2537_v31 = vadd.f32 %v2536_v24, %v2535_v22 }
  0xe8   :  { %v2538_v27 = vpop.f32.mrf.mxu1  ;;  %v657_v30 = vadd.f32 %v2515_v26, %v2303_v28 }
  0xe9   :  { %v2517_v29 = vpop.f32.mrf.mxu0 }
  0xea   :  { %v2518_v32 = vadd.f32 %v2517_v29, %v2516_v25  ;;  %v2539_v33 = vpop.f32.mrf.mxu1  ;;  %v698_v37 = vadd.f32 %v2537_v31, %v657_v30 }
  0xeb   :  { %v2540_v42 = vadd.f32 %v2539_v33, %v2538_v27 }
  0xec   :  { %v660_v38 = vadd.f32 %v2518_v32, %v2303_v28 }
  0xee   :  { %v701_v46 = vadd.f32 %v2540_v42, %v660_v38  ;;  %v2381_v42 = vld [vmem:[%s3709_s10 + $0x2] ss:$0 sm:$0xff] }
 0x103   :  { %v2557_v34 = vpop.f32.mrf.mxu0 }
 0x104   :  { %v2579_v35 = vpop.f32.mrf.mxu1 }
 0x105   :  { %v2558_v36 = vpop.f32.mrf.mxu0 }
 0x106   :  { %v2559_v39 = vadd.f32 %v2558_v36, %v2557_v34  ;;  %v2580_v40 = vpop.f32.mrf.mxu1 }
 0x107   :  { %v2560_v41 = vpop.f32.mrf.mxu0  ;;  %v2581_v47 = vadd.f32 %v2580_v40, %v2579_v35 }
 0x108   :  { %v739_v43 = vadd.f32 %v2559_v39, %v698_v37  ;;  %v2582_v44 = vpop.f32.mrf.mxu1 }
 0x109   :  { %v2561_v45 = vpop.f32.mrf.mxu0 }
 0x10a   :  { %v2562_v48 = vadd.f32 %v2561_v45, %v2560_v41  ;;  %v2583_v49 = vpop.f32.mrf.mxu1  ;;  %v780_v50 = vadd.f32 %v2581_v47, %v739_v43 }
 0x10b   :  { %v2584_v52 = vadd.f32 %v2583_v49, %v2582_v44 }
 0x10c   :  { %v742_v51 = vadd.f32 %v2562_v48, %v701_v46  ;;  %v786_v54 = vmax.f32 %v780_v50, 0.0  ;;  %v2382_v46 = vld [vmem:[%s3709_s10 + $0x4] ss:$0 sm:$0xff] }
 0x10e   :  { %v783_v53 = vadd.f32 %v2584_v52, %v742_v51 }
 0x110   :  { %v787_v55 = vmax.f32 %v783_v53, 0.0 }
 0x112   :  { %v788_v56 = vpack.c.bf16 %v787_v55, %v786_v54  ;;  %v2894_v54 = vld [vmem:[%s3711_s8 + $0x10] sm:$0xff]   ;;  %v2895_v55 = vld [vmem:[%s3711_s8 + $0x8] sm:$0xff]  }
 0x114   :  { %2724 = vmatmul.mubr.msk.bf16.vlgmr.msra.gmra.mxu0 %vm821_vm1, %v788_v56  ;;  %v2896_v56 = vld [vmem:[%s3711_s8] sm:$0xff]  }
 0x115   :  { %2755 = vmatprep.mubr.msk.bf16.mxu0 %vm3002_vm0, %v3001_v17  ;;  %2748 = vmatpush3.bf16.msra.mxu0 %v2893_v1 }
 0x116   :  { %2749 = vmatprep.subr.bf16.mxu0 %v3001_v17 }
 0x119   :  { %2750 = vmatpush3.bf16.msra.mxu0 %v2894_v54 }
 0x11a   :  { %2751 = vmatprep.subr.bf16.mxu0 %v3001_v17 }
 0x11d   :  { %2752 = vmatpush3.bf16.msra.mxu0 %v2895_v55 }
 0x11e   :  { %2753 = vmatprep.subr.bf16.mxu0 %v3001_v17 }
 0x121   :  { %2754 = vmatpush3.bf16.msra.mxu0 %v2896_v56 }
 0x122   :  { %2759 = vmatprep.subr.bf16.mxu0 %v3001_v17 }
 0x1d4   :  { %v859_v2 = vpop.f32.mrf.mxu0 }
 0x1d5   :  { %v866_v3 = vrot.slane %v859_v2, 4 }
 0x1d6   :  { %v2725_v4 = vpop.f32.mrf.mxu0 }
 0x1d7   :  { %v867_v5 = vadd.f32 %v866_v3, %v859_v2  ;;  %v2897_v3 = vld [vmem:[%s3712_s9 + $0x38] sm:$0xff]  }
 0x1d8   :  { %v862_v6 = vpop.f32.mrf.mxu0  ;;  %v2898_v4 = vld [vmem:[%s3713_s3 + $0x78] sm:$0xff]  }
 0x1d9   :  { %v868_v7 = vrot.slane %v867_v5, 2  ;;  %v872_v8 = vrot.slane %v862_v6, 4  ;;  %2613 = vmatprep.subr.bf16.mxu1 %v2898_v4 }
 0x1da   :  { %v2726_v9 = vpop.f32.mrf.mxu0 }
 0x1db   :  { %v869_v10 = vadd.f32 %v868_v7, %v867_v5  ;;  %v873_v11 = vadd.f32 %v872_v8, %v862_v6  ;;  %v2899_v5 = vld [vmem:[%s3713_s3 + $0x38] sm:$0xff]   ;;  %v2901_v7 = vld [vmem:[%s3713_s3 + $0x70] sm:$0xff]   ;;  %v2903_v9 = vld [vmem:[%s3712_s9 + $0x28] sm:$0xff]  }
 0x1dc   :  { %v2902_v8 = vld [vmem:[%s3713_s3 + $0x30] sm:$0xff]  }
 0x1dd   :  { %v870_v12 = vrot.slane %v869_v10, 1  ;;  %v874_v13 = vrot.slane %v873_v11, 2 }
 0x1df   :  { %v871_v14 = vadd.f32 %v870_v12, %v869_v10  ;;  %v875_v15 = vadd.f32 %v874_v13, %v873_v11  ;;  %v2904_v10 = vld [vmem:[%s3713_s3 + $0x68] sm:$0xff]   ;;  %v2906_v12 = vld [vmem:[%s3712_s9 + $0x20] sm:$0xff]  }
 0x1e0   :  { %v2905_v11 = vld [vmem:[%s3713_s3 + $0x28] sm:$0xff]   ;;  %v2907_v13 = vld [vmem:[%s3713_s3 + $0x60] sm:$0xff]  }
 0x1e1   :  { %v879_v16 = vmul.f32 0.125, %v871_v14  ;;  %v876_v18 = vrot.slane %v875_v15, 1  ;;  %v2908_v14 = vld [vmem:[%s3713_s3 + $0x20] sm:$0xff]  }
 0x1e3   :  { %v881_v19 = vsub.f32 %v859_v2, %v879_v16  ;;  %v877_v20 = vadd.f32 %v876_v18, %v875_v15  ;;  %v2909_v15 = vld [vmem:[%s3712_s9 + $0x18] sm:$0xff]  }
 0x1e4   :  { %v2910_v16 = vld [vmem:[%s3713_s3 + $0x58] sm:$0xff]  }
 0x1e5   :  { %v883_v21 = vmul.f32 %v881_v19, %v881_v19  ;;  %v880_v22 = vmul.f32 0.125, %v877_v20  ;;  %v2911_v18 = vld [vmem:[%s3713_s3 + $0x18] sm:$0xff]   ;;  %v2913_v20 = vld [vmem:[%s3713_s3 + $0x50] sm:$0xff]  }
 0x1e7   :  { %v885_v23 = vrot.slane %v883_v21, 4  ;;  %v882_v24 = vsub.f32 %v862_v6, %v880_v22  ;;  %v2900_v6 = vld [vmem:[%s3712_s9 + $0x30] sm:$0xff]   ;;  %v2915_v22 = vld [vmem:[%s3712_s9 + $0x8] sm:$0xff]  }
 0x1e9   :  { %v886_v25 = vadd.f32 %v885_v23, %v883_v21  ;;  %v884_v26 = vmul.f32 %v882_v24, %v882_v24  ;;  %v2914_v21 = vld [vmem:[%s3713_s3 + $0x10] sm:$0xff]   ;;  %v2916_v23 = vld [vmem:[%s3713_s3 + $0x48] sm:$0xff]  }
 0x1eb   :  { %v887_v27 = vrot.slane %v886_v25, 2  ;;  %v891_v28 = vrot.slane %v884_v26, 4 }
 0x1ed   :  { %v888_v29 = vadd.f32 %v887_v27, %v886_v25  ;;  %v892_v30 = vadd.f32 %v891_v28, %v884_v26  ;;  %v2918_v25 = vld [vmem:[%s3712_s9] sm:$0xff]   ;;  %v2921_v28 = vld [vmem:[%s3713_s3 + $0xf8] sm:$0xff]  }
 0x1ee   :  { %v2919_v26 = vld [vmem:[%s3713_s3 + $0x40] sm:$0xff]  }
 0x1ef   :  { %v889_v31 = vrot.slane %v888_v29, 1  ;;  %v893_v32 = vrot.slane %v892_v30, 2  ;;  %v2920_v27 = vld [vmem:[%s3713_s3] sm:$0xff]  }
 0x1f1   :  { %v890_v33 = vadd.f32 %v889_v31, %v888_v29  ;;  %v894_v34 = vadd.f32 %v893_v32, %v892_v30  ;;  %v58_v29 = vld [vmem:[%s3714_s1] sm:$0xff]  ;;  %v2923_v32 = vld [vmem:[%s3713_s3 + $0x178] sm:$0xff]  }
 0x1f2   :  { %v62_v30 = vld [vmem:[%s3714_s1 + $0x20] sm:$0xff] }
 0x1f3   :  { %v897_v35 = vmul.f32 0.125, %v890_v33  ;;  %v895_v36 = vrot.slane %v894_v34, 1  ;;  %v2410_v31 = vcombine.high %v58_v29, %v62_v30  ;;  %v2409_v33 = vcombine.low %v58_v29, %v62_v30  ;;  %v2397_v29 = vld [vmem:[%s3709_s10 + $0x8] ss:$0 sm:$0xff] }
 0x1f5   :  { %v899_v37 = vadd.f32 1e-05, %v897_v35  ;;  %v896_v38 = vadd.f32 %v895_v36, %v894_v34  ;;  %v2924_v34 = vld [vmem:[%s3713_s3 + $0x138] sm:$0xff]   ;;  %v2927_v35 = vld [vmem:[%s3713_s3 + $0x170] sm:$0xff]  }
 0x1f6   :  { %v2928_v36 = vld [vmem:[%s3713_s3 + $0x130] sm:$0xff]  }
 0x1f7   :  { %2981 = vrsqrt.f32 %v899_v37  ;;  %v898_v39 = vmul.f32 0.125, %v896_v38  ;;  %v2931_v37 = vld [vmem:[%s3713_s3 + $0x168] sm:$0xff]  }
 0x1f8   :  { %v2932_v38 = vld [vmem:[%s3713_s3 + $0x128] sm:$0xff]  }
 0x1f9   :  { %v900_v40 = vadd.f32 1e-05, %v898_v39  ;;  %v2935_v39 = vld [vmem:[%s3713_s3 + $0x160] sm:$0xff]  }
 0x1fb   :  { %2983 = vrsqrt.f32 %v900_v40  ;;  %v2936_v40 = vld [vmem:[%s3713_s3 + $0x120] sm:$0xff]  }
 0x204   :  { %v2982_v41 = vpop.eup %2981 }
 0x205   :  { %v903_v43 = vmul.f32 %v2982_v41, %v881_v19  ;;  %v2912_v19 = vld [vmem:[%s3712_s9 + $0x10] sm:$0xff]   ;;  %v2939_v41 = vld [vmem:[%s3713_s3 + $0x158] sm:$0xff]  }
 0x207   :  { %v909_v44 = vmul.f32 %v2381_v42, %v903_v43  ;;  %v2943_v43 = vld [vmem:[%s3713_s3 + $0x150] sm:$0xff]  }
 0x208   :  { %v2984_v45 = vpop.eup %2983 }
 0x209   :  { %v904_v47 = vmul.f32 %v2984_v45, %v882_v24  ;;  %v915_v48 = vadd.f32 %v2382_v46, %v909_v44  ;;  %v2917_v24 = vld [vmem:[%s3713_s3 + $0x8] sm:$0xff]   ;;  %v2944_v44 = vld [vmem:[%s3713_s3 + $0x110] sm:$0xff]  }
 0x20a   :  { %v2947_v45 = vld [vmem:[%s3713_s3 + $0x148] sm:$0xff]  }
 0x20b   :  { %v910_v49 = vmul.f32 %v2381_v42, %v904_v47  ;;  %v917_v51 = vmax.f32 %v915_v48, 0.0  ;;  %v2940_v42 = vld [vmem:[%s3713_s3 + $0x118] sm:$0xff]   ;;  %v2951_v47 = vld [vmem:[%s3713_s3 + $0x140] sm:$0xff]  }
 0x20c   :  { %v2952_v48 = vld [vmem:[%s3713_s3 + $0x100] sm:$0xff]  }
 0x20d   :  { %v916_v50 = vadd.f32 %v2382_v46, %v910_v49  ;;  %v2948_v46 = vld [vmem:[%s3713_s3 + $0x108] sm:$0xff]   ;;  %v60_v49 = vld [vmem:[%s3714_s1 + $0x10] sm:$0xff] }
 0x20f   :  { %v918_v52 = vmax.f32 %v916_v50, 0.0  ;;  %v64_v50 = vld [vmem:[%s3714_s1 + $0x30] sm:$0xff] }
 0x211   :  { %v919_v53 = vpack.c.bf16 %v918_v52, %v917_v51  ;;  %v2414_v51 = vcombine.high %v60_v49, %v64_v50  ;;  %v2413_v52 = vcombine.low %v60_v49, %v64_v50  ;;  %v2933_v49 = vld [vmem:[%s3713_s3 + $0xe0] sm:$0xff]  }
 0x212   :  { %v2934_v50 = vld [vmem:[%s3713_s3 + $0xa0] sm:$0xff]  }
 0x213   :  { %2744 = vmatmul.mubr.bf16.vlgmr.msra.gmra.mxu1 %v919_v53 }
 0x214   :  { %2614 = vmatpush3.bf16.msra.mxu1 %v2899_v5  ;;  %1860 = vmatprep.mubr.bf16.mxu1 %v2410_v31 }
 0x215   :  { %2615 = vmatprep.subr.bf16.mxu1 %v2901_v7 }
 0x218   :  { %2616 = vmatpush3.bf16.msra.mxu1 %v2902_v8 }
 0x219   :  { %2617 = vmatprep.subr.bf16.mxu1 %v2904_v10 }
 0x21c   :  { %2618 = vmatpush3.bf16.msra.mxu1 %v2905_v11 }
 0x21d   :  { %2619 = vmatprep.subr.bf16.mxu1 %v2907_v13 }
 0x220   :  { %2620 = vmatpush3.bf16.msra.mxu1 %v2908_v14 }
 0x221   :  { %2621 = vmatprep.subr.bf16.mxu1 %v2910_v16 }
 0x224   :  { %2622 = vmatpush3.bf16.msra.mxu1 %v2911_v18 }
 0x225   :  { %2623 = vmatprep.subr.bf16.mxu1 %v2913_v20 }
 0x228   :  { %2624 = vmatpush3.bf16.msra.mxu1 %v2914_v21 }
 0x229   :  { %2625 = vmatprep.subr.bf16.mxu1 %v2916_v23 }
 0x22c   :  { %2626 = vmatpush3.bf16.msra.mxu1 %v2917_v24 }
 0x22d   :  { %2627 = vmatprep.subr.bf16.mxu1 %v2919_v26 }
 0x230   :  { %2628 = vmatpush3.bf16.msra.mxu1 %v2920_v27 }
 0x231   :  { %2657 = vmatprep.subr.bf16.mxu1 %v2923_v32 }
 0x233   :  { %1861 = vmatmul.mubr.bf16.vlgmr.msra.gmra.mxu1 %v2409_v33  ;;  %v2398_v33 = vld [vmem:[%s3709_s10 + $0x9] ss:$0 sm:$0xff] }
 0x234   :  { %2658 = vmatpush3.bf16.msra.mxu1 %v2924_v34  ;;  %1942 = vmatprep.mubr.bf16.mxu1 %v2414_v51  ;;  %v2937_v51 = vld [vmem:[%s3713_s3 + $0xd8] sm:$0xff]  }
 0x235   :  { %2659 = vmatprep.subr.bf16.mxu1 %v2927_v35 }
 0x238   :  { %2660 = vmatpush3.bf16.msra.mxu1 %v2928_v36 }
 0x239   :  { %2661 = vmatprep.subr.bf16.mxu1 %v2931_v37 }
 0x23c   :  { %2662 = vmatpush3.bf16.msra.mxu1 %v2932_v38  ;;  %v59_v38 = vld [vmem:[%s3714_s1 + $0x8] sm:$0xff] }
 0x23d   :  { %2663 = vmatprep.subr.bf16.mxu1 %v2935_v39  ;;  %v63_v39 = vld [vmem:[%s3714_s1 + $0x28] sm:$0xff] }
 0x240   :  { %2664 = vmatpush3.bf16.msra.mxu1 %v2936_v40 }
 0x241   :  { %2665 = vmatprep.subr.bf16.mxu1 %v2939_v41 }
 0x244   :  { %2666 = vmatpush3.bf16.msra.mxu1 %v2940_v42  ;;  %v2922_v42 = vld [vmem:[%s3713_s3 + $0xb8] sm:$0xff]  }
 0x245   :  { %2667 = vmatprep.subr.bf16.mxu1 %v2943_v43  ;;  %v2412_v43 = vcombine.high %v59_v38, %v63_v39 }
 0x248   :  { %2668 = vmatpush3.bf16.msra.mxu1 %v2944_v44 }
 0x249   :  { %2669 = vmatprep.subr.bf16.mxu1 %v2947_v45  ;;  %v2925_v45 = vld [vmem:[%s3713_s3 + $0xf0] sm:$0xff]  }
 0x24c   :  { %2670 = vmatpush3.bf16.msra.mxu1 %v2948_v46  ;;  %v2926_v46 = vld [vmem:[%s3713_s3 + $0xb0] sm:$0xff]  }
 0x24d   :  { %2671 = vmatprep.subr.bf16.mxu1 %v2951_v47  ;;  %v2929_v47 = vld [vmem:[%s3713_s3 + $0xe8] sm:$0xff]  }
 0x250   :  { %2672 = vmatpush3.bf16.msra.mxu1 %v2952_v48  ;;  %v2930_v48 = vld [vmem:[%s3713_s3 + $0xa8] sm:$0xff]  }
 0x251   :  { %2779 = vmatprep.subr.bf16.mxu1 %v3001_v17 }
 0x253   :  { %1943 = vmatmul.mubr.bf16.vlgmr.msra.gmra.mxu1 %v2413_v52  ;;  %v2938_v52 = vld [vmem:[%s3713_s3 + $0x98] sm:$0xff]  }
 0x254   :  { %2787 = vmatprep.mubr.msk.bf16.mxu1 %vm3002_vm0, %v3001_v17 }
 0x2d3   :  { %v1022_v58 = vpop.f32.mrf.mxu1 }
 0x2d4   :  { %v1023_v60 = vadd.f32 %v2383_v57, %v1022_v58 }
 0x2d5   :  { %v2745_v59 = vpop.f32.mrf.mxu1 }
 0x2d6   :  { %v1029_v0 = vmax.f32 %v1023_v60, 0.0 }
 0x2d7   :  { %v1025_v61 = vpop.f32.mrf.mxu1 }
 0x2d8   :  { %v1026_v62 = vadd.f32 %v2383_v57, %v1025_v61 }
 0x2d9   :  { %v2746_v63 = vpop.f32.mrf.mxu1 }
 0x2da   :  { %v1030_v1 = vmax.f32 %v1026_v62, 0.0 }
 0x2dc   :  { %v1031_v2 = vpack.c.bf16 %v1030_v1, %v1029_v0 }
 0x2de   :  { %2756 = vmatmul.mubr.msk.bf16.vlgmr.msra.gmra.mxu0 %vm821_vm1, %v1031_v2 }
 0x2df   :  { %2775 = vmatprep.mubr.msk.bf16.mxu0 %vm3002_vm0, %v3001_v17  ;;  %2760 = vmatpush3.bf16.msra.mxu0 %v2897_v3 }
 0x2e0   :  { %2761 = vmatprep.subr.bf16.mxu0 %v3001_v17 }
 0x2e3   :  { %2762 = vmatpush3.bf16.msra.mxu0 %v2900_v6 }
 0x2e4   :  { %2763 = vmatprep.subr.bf16.mxu0 %v3001_v17 }
 0x2e7   :  { %2764 = vmatpush3.bf16.msra.mxu0 %v2903_v9 }
 0x2e8   :  { %2765 = vmatprep.subr.bf16.mxu0 %v3001_v17 }
 0x2eb   :  { %2766 = vmatpush3.bf16.msra.mxu0 %v2906_v12 }
 0x2ec   :  { %2767 = vmatprep.subr.bf16.mxu0 %v3001_v17 }
 0x2ef   :  { %2768 = vmatpush3.bf16.msra.mxu0 %v2909_v15 }
 0x2f0   :  { %2769 = vmatprep.subr.bf16.mxu0 %v3001_v17 }
 0x2f3   :  { %2770 = vmatpush3.bf16.msra.mxu0 %v2912_v19 }
 0x2f4   :  { %2771 = vmatprep.subr.bf16.mxu0 %v3001_v17 }
 0x2f7   :  { %2772 = vmatpush3.bf16.msra.mxu0 %v2915_v22 }
 0x2f8   :  { %2773 = vmatprep.subr.bf16.mxu0 %v3001_v17 }
 0x2fb   :  { %2774 = vmatpush3.bf16.msra.mxu0 %v2918_v25 }
 0x2fc   :  { %2635 = vmatprep.subr.bf16.mxu0 %v2921_v28 }
 0x39e   :  { %v1101_v53 = vpop.f32.mrf.mxu0 }
 0x39f   :  { %v1108_v54 = vrot.slane %v1101_v53, 4 }
 0x3a0   :  { %v2757_v55 = vpop.f32.mrf.mxu0 }
 0x3a1   :  { %v1109_v56 = vadd.f32 %v1108_v54, %v1101_v53  ;;  %v2942_v54 = vld [vmem:[%s3713_s3 + $0x90] sm:$0xff]   ;;  %v2945_v55 = vld [vmem:[%s3713_s3 + $0xc8] sm:$0xff]  }
 0x3a2   :  { %v1104_v57 = vpop.f32.mrf.mxu0 }
 0x3a3   :  { %v1110_v58 = vrot.slane %v1109_v56, 2  ;;  %v1114_v59 = vrot.slane %v1104_v57, 4 }
 0x3a4   :  { %v2758_v60 = vpop.f32.mrf.mxu0 }
 0x3a5   :  { %v1111_v61 = vadd.f32 %v1110_v58, %v1109_v56  ;;  %v1115_v62 = vadd.f32 %v1114_v59, %v1104_v57  ;;  %v2946_v56 = vld [vmem:[%s3713_s3 + $0x88] sm:$0xff]   ;;  %v2950_v58 = vld [vmem:[%s3713_s3 + $0x80] sm:$0xff]   ;;  %v2953_v59 = vld [vmem:[%s3713_s3 + $0x1f8] sm:$0xff]  }
 0x3a6   :  { %v61_v60 = vld [vmem:[%s3714_s1 + $0x18] sm:$0xff] }
 0x3a7   :  { %v1112_v63 = vrot.slane %v1111_v61, 1  ;;  %v1116_v0 = vrot.slane %v1115_v62, 2 }
 0x3a9   :  { %v1113_v1 = vadd.f32 %v1112_v63, %v1111_v61  ;;  %v1117_v2 = vadd.f32 %v1116_v0, %v1115_v62  ;;  %v65_v61 = vld [vmem:[%s3714_s1 + $0x38] sm:$0xff]  ;;  %v2411_v62 = vcombine.low %v59_v38, %v63_v39 }
 0x3aa   :  { %v2954_v63 = vld [vmem:[%s3713_s3 + $0x1b8] sm:$0xff]   ;;  %v2416_v0 = vcombine.high %v61_v60, %v65_v61 }
 0x3ab   :  { %v1120_v3 = vmul.f32 0.125, %v1113_v1  ;;  %v1118_v4 = vrot.slane %v1117_v2, 1  ;;  %v2955_v1 = vld [vmem:[%s3713_s3 + $0x1f0] sm:$0xff]  }
 0x3ad   :  { %v1122_v5 = vsub.f32 %v1101_v53, %v1120_v3  ;;  %v1119_v6 = vadd.f32 %v1118_v4, %v1117_v2  ;;  %v2941_v53 = vld [vmem:[%s3713_s3 + $0xd0] sm:$0xff]   ;;  %v2957_v3 = vld [vmem:[%s3713_s3 + $0x1e8] sm:$0xff]  }
 0x3ae   :  { %v2956_v2 = vld [vmem:[%s3713_s3 + $0x1b0] sm:$0xff]   ;;  %v2958_v4 = vld [vmem:[%s3713_s3 + $0x1a8] sm:$0xff]  }
 0x3af   :  { %v1124_v7 = vmul.f32 %v1122_v5, %v1122_v5  ;;  %v1121_v8 = vmul.f32 0.125, %v1119_v6  ;;  %v2960_v6 = vld [vmem:[%s3713_s3 + $0x1a0] sm:$0xff]  }
 0x3b1   :  { %v1126_v9 = vrot.slane %v1124_v7, 4  ;;  %v1123_v10 = vsub.f32 %v1104_v57, %v1121_v8  ;;  %v2949_v57 = vld [vmem:[%s3713_s3 + $0xc0] sm:$0xff]   ;;  %v2962_v8 = vld [vmem:[%s3713_s3 + $0x198] sm:$0xff]  }
 0x3b3   :  { %v1127_v11 = vadd.f32 %v1126_v9, %v1124_v7  ;;  %v1125_v12 = vmul.f32 %v1123_v10, %v1123_v10  ;;  %v2961_v7 = vld [vmem:[%s3713_s3 + $0x1d8] sm:$0xff]   ;;  %v2963_v9 = vld [vmem:[%s3713_s3 + $0x1d0] sm:$0xff]  }
 0x3b5   :  { %v1128_v13 = vrot.slane %v1127_v11, 2  ;;  %v1132_v14 = vrot.slane %v1125_v12, 4 }
 0x3b7   :  { %v1129_v15 = vadd.f32 %v1128_v13, %v1127_v11  ;;  %v1133_v16 = vadd.f32 %v1132_v14, %v1125_v12  ;;  %v2965_v11 = vld [vmem:[%s3713_s3 + $0x1c8] sm:$0xff]   ;;  %v2967_v13 = vld [vmem:[%s3713_s3 + $0x1c0] sm:$0xff]  }
 0x3b8   :  { %v2966_v12 = vld [vmem:[%s3713_s3 + $0x188] sm:$0xff]   ;;  %v2968_v14 = vld [vmem:[%s3713_s3 + $0x180] sm:$0xff]  }
 0x3b9   :  { %v1130_v18 = vrot.slane %v1129_v15, 1  ;;  %v1134_v19 = vrot.slane %v1133_v16, 2 }
 0x3bb   :  { %v1131_v20 = vadd.f32 %v1130_v18, %v1129_v15  ;;  %v1135_v21 = vadd.f32 %v1134_v19, %v1133_v16  ;;  %v2415_v15 = vcombine.low %v61_v60, %v65_v61  ;;  %v2969_v16 = vld [vmem:[%s3715_s5 + $0x18] sm:$0xff]   ;;  %v2970_v18 = vld [vmem:[%s3715_s5 + $0x10] sm:$0xff]   ;;  %v2971_v19 = vld [vmem:[%s3715_s5 + $0x8] sm:$0xff]  }
 0x3bc   :  { %2780 = vmatpush3.bf16.msra.mxu1 %v2969_v16 }
 0x3bd   :  { %v1138_v22 = vmul.f32 0.125, %v1131_v20  ;;  %v1136_v23 = vrot.slane %v1135_v21, 1  ;;  %2781 = vmatprep.subr.bf16.mxu1 %v3001_v17  ;;  %v2972_v20 = vld [vmem:[%s3715_s5] sm:$0xff]  }
 0x3bf   :  { %v1140_v24 = vadd.f32 1e-05, %v1138_v22  ;;  %v1137_v25 = vadd.f32 %v1136_v23, %v1135_v21  ;;  %v2399_v21 = vld [vmem:[%s3709_s10 + $0xa] ss:$0 sm:$0xff] }
 0x3c0   :  { %2782 = vmatpush3.bf16.msra.mxu1 %v2970_v18 }
 0x3c1   :  { %2985 = vrsqrt.f32 %v1140_v24  ;;  %v1139_v26 = vmul.f32 0.125, %v1137_v25  ;;  %2783 = vmatprep.subr.bf16.mxu1 %v3001_v17 }
 0x3c3   :  { %v1141_v27 = vadd.f32 1e-05, %v1139_v26 }
 0x3c4   :  { %2784 = vmatpush3.bf16.msra.mxu1 %v2971_v19 }
 0x3c5   :  { %2987 = vrsqrt.f32 %v1141_v27  ;;  %2785 = vmatprep.subr.bf16.mxu1 %v3001_v17 }
 0x3c8   :  { %2786 = vmatpush3.bf16.msra.mxu1 %v2972_v20 }
 0x3c9   :  { %2791 = vmatprep.subr.bf16.mxu1 %v3001_v17 }
 0x3ce   :  { %v2986_v28 = vpop.eup %2985 }
 0x3cf   :  { %v1144_v30 = vmul.f32 %v2986_v28, %v1122_v5  ;;  %v2959_v5 = vld [vmem:[%s3713_s3 + $0x1e0] sm:$0xff]  }
 0x3d1   :  { %v1150_v31 = vmul.f32 %v2397_v29, %v1144_v30 }
 0x3d2   :  { %v2988_v32 = vpop.eup %2987 }
 0x3d3   :  { %v1145_v34 = vmul.f32 %v2988_v32, %v1123_v10  ;;  %v1156_v35 = vadd.f32 %v2398_v33, %v1150_v31  ;;  %v2964_v10 = vld [vmem:[%s3713_s3 + $0x190] sm:$0xff]  }
 0x3d5   :  { %v1151_v36 = vmul.f32 %v2397_v29, %v1145_v34  ;;  %v1158_v40 = vmax.f32 %v1156_v35, 0.0  ;;  %v2629_v34 = vpop.f32.mrf.mxu1 }
 0x3d7   :  { %v1157_v37 = vadd.f32 %v2398_v33, %v1151_v36  ;;  %v2630_v35 = vpop.f32.mrf.mxu1 }
 0x3d9   :  { %v1159_v41 = vmax.f32 %v1157_v37, 0.0  ;;  %v2632_v36 = vpop.f32.mrf.mxu1 }
 0x3db   :  { %v1160_v44 = vpack.c.bf16 %v1159_v41, %v1158_v40  ;;  %v2633_v37 = vpop.f32.mrf.mxu1 }
 0x3dd   :  { %2776 = vmatmul.mubr.bf16.vlgmr.msra.gmra.mxu0 %v1160_v44  ;;  %v2673_v40 = vpop.f32.mrf.mxu1  ;;  %v2408_v44 = vld [vmem:[%s3709_s10 + $0x1] ss:$0 sm:$0xff] }
 0x3de   :  { %2636 = vmatpush3.bf16.msra.mxu0 %v2922_v42  ;;  %1901 = vmatprep.mubr.bf16.mxu0 %v2412_v43  ;;  %v2631_v43 = vadd.f32 %v2630_v35, %v2629_v34 }
 0x3df   :  { %2637 = vmatprep.subr.bf16.mxu0 %v2925_v45  ;;  %v2674_v42 = vpop.f32.mrf.mxu1 }
 0x3e2   :  { %2638 = vmatpush3.bf16.msra.mxu0 %v2926_v46  ;;  %v2676_v46 = vpop.f32.mrf.mxu1 }
 0x3e3   :  { %2639 = vmatprep.subr.bf16.mxu0 %v2929_v47  ;;  %v1863_v47 = vadd.f32 %v2631_v43, %v2408_v44 }
 0x3e6   :  { %2640 = vmatpush3.bf16.msra.mxu0 %v2930_v48  ;;  %v2634_v48 = vadd.f32 %v2633_v37, %v2632_v36 }
 0x3e7   :  { %2641 = vmatprep.subr.bf16.mxu0 %v2933_v49 }
 0x3ea   :  { %2642 = vmatpush3.bf16.msra.mxu0 %v2934_v50 }
 0x3eb   :  { %2643 = vmatprep.subr.bf16.mxu0 %v2937_v51  ;;  %v2677_v51 = vpop.f32.mrf.mxu1 }
 0x3ee   :  { %2644 = vmatpush3.bf16.msra.mxu0 %v2938_v52 }
 0x3ef   :  { %2645 = vmatprep.subr.bf16.mxu0 %v2941_v53  ;;  %v1866_v53 = vadd.f32 %v2634_v48, %v2408_v44 }
 0x3f2   :  { %2646 = vmatpush3.bf16.msra.mxu0 %v2942_v54 }
 0x3f3   :  { %2647 = vmatprep.subr.bf16.mxu0 %v2945_v55  ;;  %v2675_v55 = vadd.f32 %v2674_v42, %v2673_v40 }
 0x3f6   :  { %2648 = vmatpush3.bf16.msra.mxu0 %v2946_v56 }
 0x3f7   :  { %2649 = vmatprep.subr.bf16.mxu0 %v2949_v57 }
 0x3fa   :  { %2650 = vmatpush3.bf16.msra.mxu0 %v2950_v58  ;;  %v2678_v58 = vadd.f32 %v2677_v51, %v2676_v46 }
 0x3fb   :  { %2679 = vmatprep.subr.bf16.mxu0 %v2953_v59 }
 0x3fd   :  { %1902 = vmatmul.mubr.bf16.vlgmr.msra.gmra.mxu0 %v2411_v62 }
 0x3fe   :  { %2680 = vmatpush3.bf16.msra.mxu0 %v2954_v63  ;;  %1983 = vmatprep.mubr.bf16.mxu0 %v2416_v0 }
 0x3ff   :  { %2681 = vmatprep.subr.bf16.mxu0 %v2955_v1 }
 0x402   :  { %2682 = vmatpush3.bf16.msra.mxu0 %v2956_v2 }
 0x403   :  { %2683 = vmatprep.subr.bf16.mxu0 %v2957_v3 }
 0x406   :  { %2684 = vmatpush3.bf16.msra.mxu0 %v2958_v4 }
 0x407   :  { %2685 = vmatprep.subr.bf16.mxu0 %v2959_v5 }
 0x40a   :  { %2686 = vmatpush3.bf16.msra.mxu0 %v2960_v6  ;;  %v2973_v6 = vld [vmem:[%s3716_s7 + $0x38] sm:$0xff]  }
 0x40b   :  { %2687 = vmatprep.subr.bf16.mxu0 %v2961_v7  ;;  %v2974_v7 = vld [vmem:[%s3716_s7 + $0x30] sm:$0xff]  }
 0x40e   :  { %2688 = vmatpush3.bf16.msra.mxu0 %v2962_v8  ;;  %v2975_v8 = vld [vmem:[%s3716_s7 + $0x28] sm:$0xff]  }
 0x40f   :  { %2689 = vmatprep.subr.bf16.mxu0 %v2963_v9  ;;  %v2976_v9 = vld [vmem:[%s3716_s7 + $0x20] sm:$0xff]  }
 0x412   :  { %2690 = vmatpush3.bf16.msra.mxu0 %v2964_v10  ;;  %v2977_v10 = vld [vmem:[%s3716_s7 + $0x18] sm:$0xff]  }
 0x413   :  { %2691 = vmatprep.subr.bf16.mxu0 %v2965_v11  ;;  %v2978_v11 = vld [vmem:[%s3716_s7 + $0x10] sm:$0xff]  }
 0x416   :  { %2692 = vmatpush3.bf16.msra.mxu0 %v2966_v12  ;;  %v2979_v12 = vld [vmem:[%s3716_s7 + $0x8] sm:$0xff]  }
 0x417   :  { %2693 = vmatprep.subr.bf16.mxu0 %v2967_v13  ;;  %v2980_v13 = vld [vmem:[%s3716_s7] sm:$0xff]  }
 0x41a   :  { %2694 = vmatpush3.bf16.msra.mxu0 %v2968_v14 }
 0x41d   :  { %1984 = vmatmul.mubr.bf16.vlgmr.msra.gmra.mxu0 %v2415_v15 }
 0x49d   :  { %v1263_v22 = vpop.f32.mrf.mxu0 }
 0x49e   :  { %v1264_v23 = vadd.f32 %v2399_v21, %v1263_v22 }
 0x49f   :  { %v2777_v24 = vpop.f32.mrf.mxu0 }
 0x4a0   :  { %v3641_v25 = vmax.f32 %v1264_v23, 0.0 }
 0x4a1   :  { %v1266_v26 = vpop.f32.mrf.mxu0 }
 0x4a2   :  { %v1267_v27 = vadd.f32 %v2399_v21, %v1266_v26  ;;  %v2239_v28 = vmul.f32 %v3641_v25, %v3641_v25 }
 0x4a3   :  { %v2778_v29 = vpop.f32.mrf.mxu0 }
 0x4a4   :  { %v3645_v30 = vmax.f32 %v1267_v27, 0.0  ;;  %v2240_v31 = vsel %vm821_vm1, %v2239_v28, 0.0 }
 0x4a5   :  { %2241 = vadd.xlane.f32.xlu0 %v2240_v31 }
 0x4a6   :  { %v2270_v32 = vmul.f32 %v3645_v30, %v3645_v30 }
 0x4a8   :  { %v2271_v33 = vsel %vm821_vm1, %v2270_v32, 0.0 }
 0x4a9   :  { %2272 = vadd.xlane.f32.xlu0 %v2271_v33 }
 0x4bd   :  { %v2651_v38 = vpop.f32.mrf.mxu0 }
 0x4bf   :  { %v2652_v39 = vpop.f32.mrf.mxu0 }
 0x4c0   :  { %v2653_v49 = vadd.f32 %v2652_v39, %v2651_v38 }
 0x4c1   :  { %v2654_v41 = vpop.f32.mrf.mxu0 }
 0x4c2   :  { %v1904_v54 = vadd.f32 %v2653_v49, %v1863_v47 }
 0x4c3   :  { %v2655_v45 = vpop.f32.mrf.mxu0 }
 0x4c4   :  { %v2656_v50 = vadd.f32 %v2655_v45, %v2654_v41  ;;  %v1945_v61 = vadd.f32 %v2675_v55, %v1904_v54  ;;  %v2486_v55 = vld [vmem:[%s3709_s10 + $0x3] ss:$0 sm:$0xff] }
 0x4c6   :  { %v1907_v57 = vadd.f32 %v2656_v50, %v1866_v53 }
 0x4c8   :  { %v1948_v63 = vadd.f32 %v2678_v58, %v1907_v57 }
 0x4dd   :  { %v2695_v52 = vpop.f32.mrf.mxu0 }
 0x4df   :  { %v2696_v56 = vpop.f32.mrf.mxu0 }
 0x4e0   :  { %v2697_v59 = vadd.f32 %v2696_v56, %v2695_v52 }
 0x4e1   :  { %v2698_v60 = vpop.f32.mrf.mxu0 }
 0x4e2   :  { %v1986_v0 = vadd.f32 %v2697_v59, %v1945_v61  ;;  %v2487_v59 = vld [vmem:[%s3709_s10 + $0x5] ss:$0 sm:$0xff] }
 0x4e3   :  { %v2699_v62 = vpop.f32.mrf.mxu0 }
 0x4e4   :  { %v2700_v1 = vadd.f32 %v2699_v62, %v2698_v60  ;;  %v1992_v3 = vmax.f32 %v1986_v0, 0.0 }
 0x4e6   :  { %v1989_v2 = vadd.f32 %v2700_v1, %v1948_v63 }
 0x4e8   :  { %v1993_v4 = vmax.f32 %v1989_v2, 0.0 }
 0x4ea   :  { %v1994_v5 = vpack.c.bf16 %v1993_v4, %v1992_v3  ;;  %v2488_v3 = vld [vmem:[%s3709_s10 + $0x7] ss:$0 sm:$0xff] }
 0x4ec   :  { %2788 = vmatmul.mubr.msk.bf16.vlgmr.msra.gmra.mxu1 %vm821_vm1, %v1994_v5 }
 0x4ed   :  { %2807 = vmatprep.mubr.msk.bf16.mxu1 %vm3002_vm0, %v3001_v17  ;;  %2792 = vmatpush3.bf16.msra.mxu1 %v2973_v6 }
 0x4ee   :  { %2793 = vmatprep.subr.bf16.mxu1 %v3001_v17 }
 0x4f1   :  { %2794 = vmatpush3.bf16.msra.mxu1 %v2974_v7 }
 0x4f2   :  { %2795 = vmatprep.subr.bf16.mxu1 %v3001_v17 }
 0x4f5   :  { %2796 = vmatpush3.bf16.msra.mxu1 %v2975_v8 }
 0x4f6   :  { %2797 = vmatprep.subr.bf16.mxu1 %v3001_v17 }
 0x4f9   :  { %2798 = vmatpush3.bf16.msra.mxu1 %v2976_v9 }
 0x4fa   :  { %2799 = vmatprep.subr.bf16.mxu1 %v3001_v17 }
 0x4fd   :  { %2800 = vmatpush3.bf16.msra.mxu1 %v2977_v10 }
 0x4fe   :  { %2801 = vmatprep.subr.bf16.mxu1 %v3001_v17 }
 0x501   :  { %2802 = vmatpush3.bf16.msra.mxu1 %v2978_v11 }
 0x502   :  { %2803 = vmatprep.subr.bf16.mxu1 %v3001_v17 }
 0x505   :  { %2804 = vmatpush3.bf16.msra.mxu1 %v2979_v12 }
 0x506   :  { %2805 = vmatprep.subr.bf16.mxu1 %v3001_v17 }
 0x509   :  { %2806 = vmatpush3.bf16.msra.mxu1 %v2980_v13 }
 0x5ac   :  { %v2064_v14 = vpop.f32.mrf.mxu1 }
 0x5ad   :  { %v2071_v15 = vrot.slane %v2064_v14, 4 }
 0x5ae   :  { %v2789_v16 = vpop.f32.mrf.mxu1 }
 0x5af   :  { %v2072_v18 = vadd.f32 %v2071_v15, %v2064_v14 }
 0x5b0   :  { %v2067_v19 = vpop.f32.mrf.mxu1 }
 0x5b1   :  { %v2073_v20 = vrot.slane %v2072_v18, 2  ;;  %v2077_v21 = vrot.slane %v2067_v19, 4 }
 0x5b2   :  { %v2790_v22 = vpop.f32.mrf.mxu1 }
 0x5b3   :  { %v2074_v23 = vadd.f32 %v2073_v20, %v2072_v18  ;;  %v2078_v24 = vadd.f32 %v2077_v21, %v2067_v19  ;;  %v2242_v21 = vpop.xlane.xlu0 %2241 }
 0x5b4   :  { %v2247_v22 = vmax.f32 %v2242_v21, 1e-24 }
 0x5b5   :  { %v2075_v26 = vrot.slane %v2074_v23, 1  ;;  %v2079_v27 = vrot.slane %v2078_v24, 2 }
 0x5b7   :  { %v2076_v28 = vadd.f32 %v2075_v26, %v2074_v23  ;;  %v2080_v29 = vadd.f32 %v2079_v27, %v2078_v24  ;;  %v2273_v23 = vpop.xlane.xlu0 %2272 }
 0x5b9   :  { %v2083_v17 = vmul.f32 0.125, %v2076_v28  ;;  %v2081_v31 = vrot.slane %v2080_v29, 1 }
 0x5bb   :  { %v2085_v32 = vsub.f32 %v2064_v14, %v2083_v17  ;;  %v2082_v33 = vadd.f32 %v2081_v31, %v2080_v29 }
 0x5bd   :  { %v2087_v34 = vmul.f32 %v2085_v32, %v2085_v32  ;;  %v2084_v35 = vmul.f32 0.125, %v2082_v33 }
 0x5bf   :  { %v2089_v36 = vrot.slane %v2087_v34, 4  ;;  %v2086_v37 = vsub.f32 %v2067_v19, %v2084_v35 }
 0x5c1   :  { %v2090_v38 = vadd.f32 %v2089_v36, %v2087_v34  ;;  %v2088_v39 = vmul.f32 %v2086_v37, %v2086_v37 }
 0x5c3   :  { %v2091_v40 = vrot.slane %v2090_v38, 2  ;;  %v2095_v41 = vrot.slane %v2088_v39, 4 }
 0x5c5   :  { %v2092_v42 = vadd.f32 %v2091_v40, %v2090_v38  ;;  %v2096_v43 = vadd.f32 %v2095_v41, %v2088_v39 }
 0x5c7   :  { %v2093_v44 = vrot.slane %v2092_v42, 1  ;;  %v2097_v45 = vrot.slane %v2096_v43, 2 }
 0x5c9   :  { %v2094_v46 = vadd.f32 %v2093_v44, %v2092_v42  ;;  %v2098_v47 = vadd.f32 %v2097_v45, %v2096_v43 }
 0x5cb   :  { %v2101_v48 = vmul.f32 0.125, %v2094_v46  ;;  %v2099_v49 = vrot.slane %v2098_v47, 1 }
 0x5cd   :  { %v2103_v50 = vadd.f32 1e-05, %v2101_v48  ;;  %v2100_v51 = vadd.f32 %v2099_v49, %v2098_v47 }
 0x5cf   :  { %2989 = vrsqrt.f32 %v2103_v50  ;;  %v2102_v52 = vmul.f32 0.125, %v2100_v51 }
 0x5d1   :  { %v2104_v53 = vadd.f32 1e-05, %v2102_v52 }
 0x5d3   :  { %2991 = vrsqrt.f32 %v2104_v53 }
 0x5d4   :  { %2993 = vrsqrt.f32 %v2247_v22 }
 0x5dc   :  { %v2990_v54 = vpop.eup %2989 }
 0x5dd   :  { %v2107_v56 = vmul.f32 %v2990_v54, %v2085_v32 }
 0x5df   :  { %v2113_v57 = vmul.f32 %v2486_v55, %v2107_v56 }
 0x5e0   :  { %v2992_v58 = vpop.eup %2991 }
 0x5e1   :  { %v2108_v60 = vmul.f32 %v2992_v58, %v2086_v37  ;;  %v2119_v61 = vadd.f32 %v2487_v59, %v2113_v57  ;;  %v2994_v17 = vpop.eup %2993 }
 0x5e3   :  { %v2114_v62 = vmul.f32 %v2486_v55, %v2108_v60  ;;  %v2121_v0 = vmax.f32 %v2119_v61, 0.0 }
 0x5e5   :  { %v2120_v63 = vadd.f32 %v2487_v59, %v2114_v62 }
 0x5e7   :  { %v2122_v1 = vmax.f32 %v2120_v63, 0.0 }
 0x5e9   :  { %v2123_v2 = vpack.c.bf16 %v2122_v1, %v2121_v0 }
 0x5eb   :  { %2808 = vmatmul.mubr.bf16.vlgmr.msra.gmra.mxu1 %v2123_v2 }
 0x6ab   :  { %v2226_v4 = vpop.f32.mrf.mxu1 }
 0x6ac   :  { %v2227_v6 = vadd.f32 %v2488_v3, %v2226_v4 }
 0x6ad   :  { %v2809_v5 = vpop.f32.mrf.mxu1 }
 0x6ae   :  { %v2233_v10 = vmax.f32 %v2227_v6, 0.0 }
 0x6af   :  { %v2229_v7 = vpop.f32.mrf.mxu1 }
 0x6b0   :  { %v2230_v8 = vadd.f32 %v2488_v3, %v2229_v7  ;;  %v2274_v16 = vmul.f32 %v2233_v10, %v2233_v10  ;;  %v2266_v19 = vmul.f32 %v2233_v10, %v3645_v30 }
 0x6b1   :  { %v2810_v9 = vpop.f32.mrf.mxu1 }
 0x6b2   :  { %v2234_v11 = vmax.f32 %v2230_v8, 0.0  ;;  %v2275_v18 = vsel %vm821_vm1, %v2274_v16, 0.0  ;;  %v2267_v20 = vsel %vm821_vm1, %v2266_v19, 0.0 }
 0x6b4   :  { %v2243_v12 = vmul.f32 %v2234_v11, %v2234_v11  ;;  %v2235_v13 = vmul.f32 %v2234_v11, %v3641_v25  ;;  %v2278_v25 = vmax.f32 %v2273_v23, 1e-24 }
 0x6b6   :  { %v2244_v14 = vsel %vm821_vm1, %v2243_v12, 0.0  ;;  %v2236_v15 = vsel %vm821_vm1, %v2235_v13, 0.0 }
 0x6b7   :  { %2245 = vadd.xlane.f32.xlu1 %v2244_v14  ;;  %2237 = vadd.xlane.f32.xlu0 %v2236_v15 }
 0x6bb   :  { %2276 = vadd.xlane.f32.xlu1 %v2275_v18 }
 0x6bf   :  { %2268 = vadd.xlane.f32.xlu1 %v2267_v20 }
 0x740   :  { %v2246_v24 = vpop.xlane.xlu1 %2245  ;;  %v2238_v29 = vpop.xlane.xlu0 %2237 }
 0x741   :  { %v2250_v26 = vmax.f32 %v2246_v24, 1e-24  ;;  %v2249_v31 = vmul.f32 %v2994_v17, %v2238_v29 }
 0x743   :  { %2995 = vrsqrt.f32 %v2250_v26 }
 0x744   :  { %v2277_v27 = vpop.xlane.xlu1 %2276  ;;  %2997 = vrsqrt.f32 %v2278_v25 }
 0x745   :  { %v2281_v28 = vmax.f32 %v2277_v27, 1e-24 }
 0x747   :  { %2999 = vrsqrt.f32 %v2281_v28 }
 0x748   :  { %v2269_v32 = vpop.xlane.xlu1 %2268 }
 0x750   :  { %v2996_v30 = vpop.eup %2995 }
 0x751   :  { %v2252_v33 = vmul.f32 %v2996_v30, %v2249_v31  ;;  %v2998_v34 = vpop.eup %2997 }
 0x752   :  { %v2280_v35 = vmul.f32 %v2998_v34, %v2269_v32 }
 0x753   :  { %v2253_v36 = vmul.f32 2.0, %v2252_v33 }
 0x754   :  { %v3000_v37 = vpop.eup %2999 }
 0x755   :  { %v2283_v38 = vmul.f32 %v3000_v37, %v2280_v35  ;;  %v2254_v39 = vsub.f32 2.0, %v2253_v36 }
 0x757   :  { %v2256_v40 = vsel %vm2255_vm2, %v2254_v39, 0.0  ;;  %v2284_v41 = vmul.f32 2.0, %v2283_v38 }
 0x758   :  { %2257 = vadd.xlane.f32.xlu0 %v2256_v40 }
 0x759   :  { %v2285_v42 = vsub.f32 2.0, %v2284_v41 }
 0x75b   :  { %v2286_v43 = vsel %vm2255_vm2, %v2285_v42, 0.0 }
 0x75c   :  { %2287 = vadd.xlane.f32.xlu1 %v2286_v43 }
 0x7e1   :  { %v2258_v44 = vpop.xlane.xlu0 %2257 }
 0x7e2   :  { %v2259_v45 = vrot.slane %v2258_v44, 4 }
 0x7e4   :  { %v2260_v46 = vadd.f32 %v2259_v45, %v2258_v44 }
 0x7e5   :  { %v2288_v47 = vpop.xlane.xlu1 %2287 }
 0x7e6   :  { %v2261_v48 = vrot.slane %v2260_v46, 2  ;;  %v2289_v49 = vrot.slane %v2288_v47, 4 }
 0x7e8   :  { %v2290_v50 = vadd.f32 %v2289_v49, %v2288_v47  ;;  %v2262_v51 = vadd.f32 %v2261_v48, %v2260_v46 }
 0x7ea   :  { %v2291_v52 = vrot.slane %v2290_v50, 2  ;;  %v2263_v53 = vrot.slane %v2262_v51, 1 }
 0x7ec   :  { %v2292_v54 = vadd.f32 %v2291_v52, %v2290_v50  ;;  %v2264_v55 = vadd.f32 %v2263_v53, %v2262_v51 }
 0x7ee   :  { %2811 = vpush %v2264_v55  ;;  %v2293_v56 = vrot.slane %v2292_v54, 1 }
 0x7f0   :  { %v2294_v57 = vadd.f32 %v2293_v56, %v2292_v54 }
 0x7f2   :  { %2813 = vpush %v2294_v57 }
 0x81f   :  { %s2812_s10 = spop %2811 }
 0x823   :  { %s2814_s3 = spop %2813 }
 0x824   :  { %s2296_s17 = sadd.f32 %s2814_s3, %s2812_s10 }
 0x826   :  { %v2297_v58 = vstv %s2296_s17 }
 0x827   :  { %2298 = vst [vmem:[%s3717_s11] sm:$0xff] %v2297_v58 }

</bundles_post_ra>
